<compile_context>
chip_gen: v7x
topology: tpu7x:2x2x1
jax: 0.10.0
libtpu: 0.0.40
codegen_flags: <defaults>
</compile_context>

<pallas_src>
import functools

import numpy as np
import jax
import jax.numpy as jnp
from jax import lax
from jax.experimental import pallas as pl
from jax.experimental.pallas import tpu as pltpu


# ----------------------------------------------------------------------------
# Small helpers
# ----------------------------------------------------------------------------
def _log2(v):
    assert v > 0 and (v & (v - 1)) == 0, f"{v} must be a power of two"
    return v.bit_length() - 1


def _round_up(v, m):
    return (v + m - 1) // m * m


def _pick_batch_tile(batch):
    """Stack as many images as possible per grid step onto the lane axis while
    keeping >=2 grid steps (v7x has 2 TensorCores; v5e/v6e only see the wider
    matmul N dimension)."""
    for bt in (8, 4, 2):
        if batch % bt == 0 and batch // bt >= 2:
            return bt
    return 1


# ----------------------------------------------------------------------------
# In-kernel building blocks (values only; all data stays in VMEM/vregs)
# ----------------------------------------------------------------------------
def _shift_px(x, d):
    """y[:, p] = x[:, (p + d) mod n] along the lane (pixel) axis.
    Wrapped / cross-image lanes are zeroed by the caller's border masks."""
    n = x.shape[1]
    s = (-d) % n
    if s == 0:
        return x
    return pltpu.roll(x, shift=s, axis=1)


def _tap_masks(n, img_h, img_w):
    """(1, n) f32 border masks for the 8 off-centre 3x3 taps.  A position is
    zeroed when its tap source lies outside the image that pixel belongs to
    (this also stops lane-stacked images and lane padding from leaking).
    Cheap: one (1, n) iota + a few compares per conv geometry."""
    p = lax.broadcasted_iota(jnp.int32, (1, n), 1)
    q = p & (img_h * img_w - 1)              # pixel index within its own image
    oi = q >> _log2(img_w)
    oj = q & (img_w - 1)
    one = jnp.ones((1, n), jnp.float32)
    row = {-1: jnp.where(oi >= 1, 1.0, 0.0), 0: one,
            1: jnp.where(oi <= img_h - 2, 1.0, 0.0)}
    col = {-1: jnp.where(oj >= 1, 1.0, 0.0), 0: one,
            1: jnp.where(oj <= img_w - 2, 1.0, 0.0)}
    return {(dh, dw): row[dh] * col[dw]
            for dh in (-1, 0, 1) for dw in (-1, 0, 1)
            if not (dh == 0 and dw == 0)}


def _conv3x3_same(x, w2d, b, masks, img_w, act):
    """3x3 / stride-1 / pad-1 convolution in channel-major layout.

    x     : (Cin, n)      pixels (lane-stacked images + lane pad) on lanes
    w2d   : (Cout, 9*Cin) tap-major flattened weights, tap t = (dh+1)*3+(dw+1)
    b     : (Cout, 1)
    masks : {(dh, dw): (1, n)} border masks
    Returns (Cout, n) after the activation.
    """
    cin, n = x.shape
    cout = w2d.shape[0]
    acc = jnp.zeros((cout, n), jnp.float32)
    t = 0
    for dh in (-1, 0, 1):
        for dw in (-1, 0, 1):
            if dh == 0 and dw == 0:
                xs = x
            else:
                xs = _shift_px(x, dh * img_w + dw) * masks[(dh, dw)]
            acc = acc + jnp.dot(w2d[:, t * cin:(t + 1) * cin], xs,
                                preferred_element_type=jnp.float32)
            t += 1
    acc = acc + b
    if act == "relu":
        return jnp.maximum(acc, 0.0)
    # numerically stable sigmoid; tanh rides the EUP slot
    return 0.5 * (jnp.tanh(0.5 * acc) + 1.0)


def _maxpool2x2(x, img_w, down):
    """2x2 / stride-2 max pool: max of 4 lane-rolled copies (VPU) followed by a
    single 0/1 'pick the top-left pixel of each window' matmul (MXU)."""
    m = jnp.maximum(jnp.maximum(x, _shift_px(x, 1)),
                    jnp.maximum(_shift_px(x, img_w), _shift_px(x, img_w + 1)))
    return jnp.dot(m, down, preferred_element_type=jnp.float32)


# ----------------------------------------------------------------------------
# Fused autoencoder kernel: one grid step == one batch tile, fully on-chip
# ----------------------------------------------------------------------------
def _autoencoder_kernel(x_ref, w1, b1, w2, b2, w3, b3, w4, b4,
                        down1, down2, up1, up2, o_ref, *, hw):
    H, W = hw
    x = x_ref[0]                                           # (3, n_full)
    n_full = x.shape[1]
    n_half = down1.shape[1]
    m_full = _tap_masks(n_full, H, W)
    m_half = _tap_masks(n_half, H // 2, W // 2)

    # ---------------- encoder ----------------
    y = _conv3x3_same(x, w1[...], b1[...], m_full, W, "relu")          # (16, n_full)
    y = _maxpool2x2(y, W, down1[...])                                  # (16, n_half)
    y = _conv3x3_same(y, w2[...], b2[...], m_half, W // 2, "relu")     # (8,  n_half)
    y = _maxpool2x2(y, W // 2, down2[...])                             # (8,  n_lat)

    # ---------------- decoder ----------------
    # ConvTranspose2d(k3, s2, p1, op1) == zero-upsample (x2 per dim) + SAME 3x3
    # conv with spatially flipped weights; the upsample is the transpose of the
    # pool-pick matrix (host precomputed).
    y = jnp.dot(y, up1[...], preferred_element_type=jnp.float32)       # (8,  n_half)
    y = _conv3x3_same(y, w3[...], b3[...], m_half, W // 2, "relu")     # (16, n_half)
    y = jnp.dot(y, up2[...], preferred_element_type=jnp.float32)       # (16, n_full)
    y = _conv3x3_same(y, w4[...], b4[...], m_full, W, "sigmoid")       # (3,  n_full)

    o_ref[0] = y


# ----------------------------------------------------------------------------
# Host-side one-time relayout (hoisted out of the jitted forward)
# ----------------------------------------------------------------------------
def _pool_pick_mats(img_h, img_w, bt, lane_align=128):
    """0/1 downsample matrix picking the top-left pixel of every 2x2 window
    (block-diagonal over the bt lane-stacked images) and its transpose (the
    zero-upsample used by the transposed convs).  Both lane dims are padded to
    multiples of 128; the pad rows/cols are zero."""
    n_in, n_out = img_h * img_w, (img_h // 2) * (img_w // 2)
    pick = np.zeros((n_in, n_out), np.float32)
    for r in range(n_out):
        ri, rj = divmod(r, img_w // 2)
        pick[2 * ri * img_w + 2 * rj, r] = 1.0
    pick = np.kron(np.eye(bt, dtype=np.float32), pick)
    rows = _round_up(bt * n_in, lane_align)
    cols = _round_up(bt * n_out, lane_align)
    down = np.zeros((rows, cols), np.float32)
    down[:bt * n_in, :bt * n_out] = pick
    return jnp.asarray(down), jnp.asarray(np.ascontiguousarray(down.T))


def prepare_kernel_inputs(params, batch, img_h, img_w):
    """Weights -> lane-dense (Cout, 9*Cin) tap-major tiles (transposed-conv
    weights spatially flipped + in/out swapped = direct-conv equivalent);
    biases -> (Cout, 1) f32; pool-pick / upsample 0/1 matrices."""
    bt = _pick_batch_tile(batch)
    down1, up2 = _pool_pick_mats(img_h, img_w, bt)
    down2, up1 = _pool_pick_mats(img_h // 2, img_w // 2, bt)

    def conv_w2d(w):        # (Cout, Cin, 3, 3) -> (Cout, 9*Cin), tap-major
        co, ci = w.shape[0], w.shape[1]
        return jnp.transpose(w, (0, 2, 3, 1)).reshape(co, 9 * ci).astype(jnp.float32)

    def convT_w2d(w):       # (Cin, Cout, 3, 3) -> direct-conv equivalent
        return conv_w2d(jnp.transpose(w[:, :, ::-1, ::-1], (1, 0, 2, 3)))

    def bias(b):
        return b.reshape(-1, 1).astype(jnp.float32)

    return {
        "w1": conv_w2d(params["enc1_w"]), "b1": bias(params["enc1_b"]),
        "w2": conv_w2d(params["enc2_w"]), "b2": bias(params["enc2_b"]),
        "w3": convT_w2d(params["dec1_w"]), "b3": bias(params["dec1_b"]),
        "w4": convT_w2d(params["dec2_w"]), "b4": bias(params["dec2_b"]),
        "down1": down1, "down2": down2, "up1": up1, "up2": up2,
    }


# ----------------------------------------------------------------------------
# Forward wrapper (single pallas_call, grid over batch tiles)
# ----------------------------------------------------------------------------
def autoencoder_forward(x_nchw, prep):
    b, c, img_h, img_w = x_nchw.shape
    assert c == 3
    assert img_h >= 4 and img_w >= 4
    assert (img_h & (img_h - 1)) == 0 and (img_w & (img_w - 1)) == 0, \
        "power-of-two spatial dims required (mask index math uses bit ops)"

    bt = _pick_batch_tile(b)
    t = b // bt
    n_pix = bt * img_h * img_w
    n_full = _round_up(n_pix, 128)
    assert prep["down1"].shape[0] == n_full, "prep built for a different batch/shape"

    # pack bt images per grid step onto the lane axis: (t, 3, bt*H*W) (+ lane pad)
    xf = x_nchw.astype(jnp.float32).reshape(t, bt, c, img_h * img_w)
    xf = jnp.transpose(xf, (0, 2, 1, 3)).reshape(t, c, n_pix)
    if n_full != n_pix:
        xf = jnp.pad(xf, ((0, 0), (0, 0), (0, n_full - n_pix)))

    kern = functools.partial(_autoencoder_kernel, hw=(img_h, img_w))

    def const_spec(a):      # whole (small) array, same block every grid step
        return pl.BlockSpec(a.shape, lambda i: (0, 0))

    names = ("w1", "b1", "w2", "b2", "w3", "b3", "w4", "b4",
             "down1", "down2", "up1", "up2")
    consts = [prep[k] for k in names]

    out = pl.pallas_call(
        kern,
        out_shape=jax.ShapeDtypeStruct((t, 3, n_full), jnp.float32),
        grid=(t,),
        in_specs=[pl.BlockSpec((1, 3, n_full), lambda i: (i, 0, 0))]
                 + [const_spec(a) for a in consts],
        out_specs=pl.BlockSpec((1, 3, n_full), lambda i: (i, 0, 0)),
        compiler_params=pltpu.CompilerParams(
            dimension_semantics=("parallel",)),          # v7x: 2 TCs share the grid
    )(xf, *consts)

    out = out[:, :, :n_pix].reshape(t, 3, bt, img_h * img_w)
    out = jnp.transpose(out, (0, 2, 1, 3)).reshape(b, 3, img_h, img_w)
    return out


# ----------------------------------------------------------------------------
# Pure-JAX (XLA) reference for validation
# ----------------------------------------------------------------------------
def reference_forward(x_nchw, params):
    dn = ("NHWC", "HWIO", "NHWC")
    x = jnp.transpose(x_nchw, (0, 2, 3, 1)).astype(jnp.float32)

    def conv(x, wt, b):
        w = jnp.transpose(wt, (2, 3, 1, 0))
        y = lax.conv_general_dilated(x, w, (1, 1), "SAME", dimension_numbers=dn)
        return jax.nn.relu(y + b)

    def pool(x):
        return lax.reduce_window(x, -jnp.inf, lax.max,
                                 (1, 2, 2, 1), (1, 2, 2, 1), "VALID")

    def convT(x, wt, b, act):
        w = jnp.transpose(wt[:, :, ::-1, ::-1], (2, 3, 0, 1))
        y = lax.conv_general_dilated(x, w, (1, 1), ((1, 2), (1, 2)),
                                     lhs_dilation=(2, 2), dimension_numbers=dn)
        y = y + b
        return jax.nn.relu(y) if act == "relu" else jax.nn.sigmoid(y)

    x = conv(x, params["enc1_w"], params["enc1_b"]); x = pool(x)
    x = conv(x, params["enc2_w"], params["enc2_b"]); x = pool(x)
    x = convT(x, params["dec1_w"], params["dec1_b"], "relu")
    x = convT(x, params["dec2_w"], params["dec2_b"], "sigmoid")
    return jnp.transpose(x, (0, 3, 1, 2))


# ----------------------------------------------------------------------------
# Deterministic parameter init (shapes from the PyTorch module's __init__)
# ----------------------------------------------------------------------------
def init_params(key):
    ks = jax.random.split(key, 8)

    def u(k, shape, fan_in):
        bound = 1.0 / jnp.sqrt(float(fan_in))
        return jax.random.uniform(k, shape, jnp.float32, -bound, bound)

    return {
        # Conv2d weights in PyTorch layout (Cout, Cin, kh, kw)
        "enc1_w": u(ks[0], (16, 3, 3, 3), 3 * 9),
        "enc1_b": u(ks[1], (16,), 3 * 9),
        "enc2_w": u(ks[2], (8, 16, 3, 3), 16 * 9),
        "enc2_b": u(ks[3], (8,), 16 * 9),
        # ConvTranspose2d weights in PyTorch layout (Cin, Cout, kh, kw)
        "dec1_w": u(ks[4], (8, 16, 3, 3), 8 * 9),
        "dec1_b": u(ks[5], (16,), 8 * 9),
        "dec2_w": u(ks[6], (16, 3, 3, 3), 16 * 9),
        "dec2_b": u(ks[7], (3,), 16 * 9),
    }


if __name__ == "__main__":
    key = jax.random.PRNGKey(0)
    k_params, k_x = jax.random.split(key)
    params = init_params(k_params)

    B, H, W = 2, 16, 16
    x = jax.random.uniform(k_x, (B, 3, H, W), jnp.float32)

    prep = prepare_kernel_inputs(params, B, H, W)   # one-time host relayout

    fwd = jax.jit(autoencoder_forward)
    out = jax.block_until_ready(fwd(x, prep))

    assert out.shape == (B, 3, H, W), out.shape
    assert bool(jnp.all(jnp.isfinite(out)))

    ref = jax.block_until_ready(reference_forward(x, params))
    assert jnp.allclose(out, ref, rtol=1e-3, atol=1e-3), \
        float(jnp.max(jnp.abs(out - ref)))

    print("KERNEL_OK")
</pallas_src>

<mosaic_0001>
module attributes {stable_mosaic.version = 11 : i64} {
  func.func @_autoencoder_kernel(%arg0: i32, %arg1: memref<1x3x256xf32, #tpu.memory_space<vmem>>, %arg2: memref<16x27xf32, #tpu.memory_space<vmem>>, %arg3: memref<16x1xf32, #tpu.memory_space<vmem>>, %arg4: memref<8x144xf32, #tpu.memory_space<vmem>>, %arg5: memref<8x1xf32, #tpu.memory_space<vmem>>, %arg6: memref<16x72xf32, #tpu.memory_space<vmem>>, %arg7: memref<16x1xf32, #tpu.memory_space<vmem>>, %arg8: memref<3x144xf32, #tpu.memory_space<vmem>>, %arg9: memref<3x1xf32, #tpu.memory_space<vmem>>, %arg10: memref<256x128xf32, #tpu.memory_space<vmem>>, %arg11: memref<128x128xf32, #tpu.memory_space<vmem>>, %arg12: memref<128x128xf32, #tpu.memory_space<vmem>>, %arg13: memref<128x256xf32, #tpu.memory_space<vmem>>, %arg14: memref<1x3x256xf32, #tpu.memory_space<vmem>>) attributes {dimension_semantics = [#tpu.dimension_semantics<parallel>], iteration_bounds = array<i64: 2>, scalar_prefetch = 0 : i64, scratch_operands = 0 : i64, tpu.core_type = #tpu.core_type<tc>, window_params = [{transform_indices = @transform_0, window_bounds = array<i64: 1, 3, 256>}, {pipeline_mode = #tpu.pipeline_mode<synchronous>, transform_indices = @transform_1, window_bounds = array<i64: 16, 27>}, {pipeline_mode = #tpu.pipeline_mode<synchronous>, transform_indices = @transform_2, window_bounds = array<i64: 16, 1>}, {pipeline_mode = #tpu.pipeline_mode<synchronous>, transform_indices = @transform_3, window_bounds = array<i64: 8, 144>}, {pipeline_mode = #tpu.pipeline_mode<synchronous>, transform_indices = @transform_4, window_bounds = array<i64: 8, 1>}, {pipeline_mode = #tpu.pipeline_mode<synchronous>, transform_indices = @transform_5, window_bounds = array<i64: 16, 72>}, {pipeline_mode = #tpu.pipeline_mode<synchronous>, transform_indices = @transform_6, window_bounds = array<i64: 16, 1>}, {pipeline_mode = #tpu.pipeline_mode<synchronous>, transform_indices = @transform_7, window_bounds = array<i64: 3, 144>}, {pipeline_mode = #tpu.pipeline_mode<synchronous>, transform_indices = @transform_8, window_bounds = array<i64: 3, 1>}, {pipeline_mode = #tpu.pipeline_mode<synchronous>, transform_indices = @transform_9, window_bounds = array<i64: 256, 128>}, {pipeline_mode = #tpu.pipeline_mode<synchronous>, transform_indices = @transform_10, window_bounds = array<i64: 128, 128>}, {pipeline_mode = #tpu.pipeline_mode<synchronous>, transform_indices = @transform_11, window_bounds = array<i64: 128, 128>}, {pipeline_mode = #tpu.pipeline_mode<synchronous>, transform_indices = @transform_12, window_bounds = array<i64: 128, 256>}, {transform_indices = @transform_13, window_bounds = array<i64: 1, 3, 256>}]} {
    %c0 = arith.constant 0 : index
    %c0_0 = arith.constant 0 : index
    %c0_1 = arith.constant 0 : index
    %0 = vector.load %arg1[%c0, %c0_0, %c0_1] : memref<1x3x256xf32, #tpu.memory_space<vmem>>, vector<1x3x256xf32>
    %1 = vector.shape_cast %0 : vector<1x3x256xf32> to vector<3x256xf32>
    %2 = tpu.iota {dimensions = array<i32: 1>} : vector<1x256xi32>
    %c255_i32 = arith.constant 255 : i32
    %3 = vector.broadcast %c255_i32 : i32 to vector<1x256xi32>
    %4 = arith.andi %2, %3 : vector<1x256xi32>
    %c4_i32 = arith.constant 4 : i32
    %5 = vector.broadcast %c4_i32 : i32 to vector<1x256xi32>
    %6 = arith.shrsi %4, %5 : vector<1x256xi32>
    %c15_i32 = arith.constant 15 : i32
    %7 = vector.broadcast %c15_i32 : i32 to vector<1x256xi32>
    %8 = arith.andi %4, %7 : vector<1x256xi32>
    %cst = arith.constant 1.000000e+00 : f32
    %9 = vector.broadcast %cst : f32 to vector<1x256xf32>
    %c1_i32 = arith.constant 1 : i32
    %10 = vector.broadcast %c1_i32 : i32 to vector<1x256xi32>
    %11 = arith.cmpi sge, %6, %10 : vector<1x256xi32>
    %cst_2 = arith.constant 1.000000e+00 : f32
    %cst_3 = arith.constant 0.000000e+00 : f32
    %12 = vector.broadcast %cst_2 : f32 to vector<1x256xf32>
    %13 = vector.broadcast %cst_3 : f32 to vector<1x256xf32>
    %14 = arith.select %11, %12, %13 : vector<1x256xi1>, vector<1x256xf32>
    %c14_i32 = arith.constant 14 : i32
    %15 = vector.broadcast %c14_i32 : i32 to vector<1x256xi32>
    %16 = arith.cmpi sle, %6, %15 : vector<1x256xi32>
    %cst_4 = arith.constant 1.000000e+00 : f32
    %cst_5 = arith.constant 0.000000e+00 : f32
    %17 = vector.broadcast %cst_4 : f32 to vector<1x256xf32>
    %18 = vector.broadcast %cst_5 : f32 to vector<1x256xf32>
    %19 = arith.select %16, %17, %18 : vector<1x256xi1>, vector<1x256xf32>
    %c1_i32_6 = arith.constant 1 : i32
    %20 = vector.broadcast %c1_i32_6 : i32 to vector<1x256xi32>
    %21 = arith.cmpi sge, %8, %20 : vector<1x256xi32>
    %cst_7 = arith.constant 1.000000e+00 : f32
    %cst_8 = arith.constant 0.000000e+00 : f32
    %22 = vector.broadcast %cst_7 : f32 to vector<1x256xf32>
    %23 = vector.broadcast %cst_8 : f32 to vector<1x256xf32>
    %24 = arith.select %21, %22, %23 : vector<1x256xi1>, vector<1x256xf32>
    %c14_i32_9 = arith.constant 14 : i32
    %25 = vector.broadcast %c14_i32_9 : i32 to vector<1x256xi32>
    %26 = arith.cmpi sle, %8, %25 : vector<1x256xi32>
    %cst_10 = arith.constant 1.000000e+00 : f32
    %cst_11 = arith.constant 0.000000e+00 : f32
    %27 = vector.broadcast %cst_10 : f32 to vector<1x256xf32>
    %28 = vector.broadcast %cst_11 : f32 to vector<1x256xf32>
    %29 = arith.select %26, %27, %28 : vector<1x256xi1>, vector<1x256xf32>
    %30 = arith.mulf %14, %24 : vector<1x256xf32>
    %31 = arith.mulf %14, %9 : vector<1x256xf32>
    %32 = arith.mulf %14, %29 : vector<1x256xf32>
    %33 = arith.mulf %9, %24 : vector<1x256xf32>
    %34 = arith.mulf %9, %29 : vector<1x256xf32>
    %35 = arith.mulf %19, %24 : vector<1x256xf32>
    %36 = arith.mulf %19, %9 : vector<1x256xf32>
    %37 = arith.mulf %19, %29 : vector<1x256xf32>
    %38 = tpu.iota {dimensions = array<i32: 1>} : vector<1x128xi32>
    %c63_i32 = arith.constant 63 : i32
    %39 = vector.broadcast %c63_i32 : i32 to vector<1x128xi32>
    %40 = arith.andi %38, %39 : vector<1x128xi32>
    %c3_i32 = arith.constant 3 : i32
    %41 = vector.broadcast %c3_i32 : i32 to vector<1x128xi32>
    %42 = arith.shrsi %40, %41 : vector<1x128xi32>
    %c7_i32 = arith.constant 7 : i32
    %43 = vector.broadcast %c7_i32 : i32 to vector<1x128xi32>
    %44 = arith.andi %40, %43 : vector<1x128xi32>
    %cst_12 = arith.constant 1.000000e+00 : f32
    %45 = vector.broadcast %cst_12 : f32 to vector<1x128xf32>
    %c1_i32_13 = arith.constant 1 : i32
    %46 = vector.broadcast %c1_i32_13 : i32 to vector<1x128xi32>
    %47 = arith.cmpi sge, %42, %46 : vector<1x128xi32>
    %cst_14 = arith.constant 1.000000e+00 : f32
    %cst_15 = arith.constant 0.000000e+00 : f32
    %48 = vector.broadcast %cst_14 : f32 to vector<1x128xf32>
    %49 = vector.broadcast %cst_15 : f32 to vector<1x128xf32>
    %50 = arith.select %47, %48, %49 : vector<1x128xi1>, vector<1x128xf32>
    %c6_i32 = arith.constant 6 : i32
    %51 = vector.broadcast %c6_i32 : i32 to vector<1x128xi32>
    %52 = arith.cmpi sle, %42, %51 : vector<1x128xi32>
    %cst_16 = arith.constant 1.000000e+00 : f32
    %cst_17 = arith.constant 0.000000e+00 : f32
    %53 = vector.broadcast %cst_16 : f32 to vector<1x128xf32>
    %54 = vector.broadcast %cst_17 : f32 to vector<1x128xf32>
    %55 = arith.select %52, %53, %54 : vector<1x128xi1>, vector<1x128xf32>
    %c1_i32_18 = arith.constant 1 : i32
    %56 = vector.broadcast %c1_i32_18 : i32 to vector<1x128xi32>
    %57 = arith.cmpi sge, %44, %56 : vector<1x128xi32>
    %cst_19 = arith.constant 1.000000e+00 : f32
    %cst_20 = arith.constant 0.000000e+00 : f32
    %58 = vector.broadcast %cst_19 : f32 to vector<1x128xf32>
    %59 = vector.broadcast %cst_20 : f32 to vector<1x128xf32>
    %60 = arith.select %57, %58, %59 : vector<1x128xi1>, vector<1x128xf32>
    %c6_i32_21 = arith.constant 6 : i32
    %61 = vector.broadcast %c6_i32_21 : i32 to vector<1x128xi32>
    %62 = arith.cmpi sle, %44, %61 : vector<1x128xi32>
    %cst_22 = arith.constant 1.000000e+00 : f32
    %cst_23 = arith.constant 0.000000e+00 : f32
    %63 = vector.broadcast %cst_22 : f32 to vector<1x128xf32>
    %64 = vector.broadcast %cst_23 : f32 to vector<1x128xf32>
    %65 = arith.select %62, %63, %64 : vector<1x128xi1>, vector<1x128xf32>
    %66 = arith.mulf %50, %60 : vector<1x128xf32>
    %67 = arith.mulf %50, %45 : vector<1x128xf32>
    %68 = arith.mulf %50, %65 : vector<1x128xf32>
    %69 = arith.mulf %45, %60 : vector<1x128xf32>
    %70 = arith.mulf %45, %65 : vector<1x128xf32>
    %71 = arith.mulf %55, %60 : vector<1x128xf32>
    %72 = arith.mulf %55, %45 : vector<1x128xf32>
    %73 = arith.mulf %55, %65 : vector<1x128xf32>
    %c0_24 = arith.constant 0 : index
    %c0_25 = arith.constant 0 : index
    %74 = vector.load %arg2[%c0_24, %c0_25] : memref<16x27xf32, #tpu.memory_space<vmem>>, vector<16x27xf32>
    %c0_26 = arith.constant 0 : index
    %c0_27 = arith.constant 0 : index
    %75 = vector.load %arg3[%c0_26, %c0_27] : memref<16x1xf32, #tpu.memory_space<vmem>>, vector<16x1xf32>
    %cst_28 = arith.constant 0.000000e+00 : f32
    %76 = vector.broadcast %cst_28 : f32 to vector<16x256xf32>
    %c17_i32 = arith.constant 17 : i32
    %77 = tpu.dynamic_rotate %1 by %c17_i32 dim 1 : vector<3x256xf32>, i32 -> vector<3x256xf32>
    %78 = vector.broadcast %30 : vector<1x256xf32> to vector<3x256xf32>
    %79 = arith.mulf %77, %78 : vector<3x256xf32>
    %80 = vector.extract_strided_slice %74 {offsets = [0, 0], sizes = [16, 3], strides = [1, 1]} : vector<16x27xf32> to vector<16x3xf32>
    %cst_29 = arith.constant dense<0.000000e+00> : vector<16x256xf32>
    %81 = tpu.matmul %80, %79, %cst_29 {dimension_numbers = #tpu.dot_dimension_numbers<[1], [0], [0], [1], [0, 0, 1, 1], [], []>} : vector<16x3xf32>, vector<3x256xf32>, vector<16x256xf32> -> vector<16x256xf32>
    %82 = arith.addf %76, %81 : vector<16x256xf32>
    %c16_i32 = arith.constant 16 : i32
    %83 = tpu.dynamic_rotate %1 by %c16_i32 dim 1 : vector<3x256xf32>, i32 -> vector<3x256xf32>
    %84 = vector.broadcast %31 : vector<1x256xf32> to vector<3x256xf32>
    %85 = arith.mulf %83, %84 : vector<3x256xf32>
    %86 = vector.extract_strided_slice %74 {offsets = [0, 3], sizes = [16, 3], strides = [1, 1]} : vector<16x27xf32> to vector<16x3xf32>
    %cst_30 = arith.constant dense<0.000000e+00> : vector<16x256xf32>
    %87 = tpu.matmul %86, %85, %cst_30 {dimension_numbers = #tpu.dot_dimension_numbers<[1], [0], [0], [1], [0, 0, 1, 1], [], []>} : vector<16x3xf32>, vector<3x256xf32>, vector<16x256xf32> -> vector<16x256xf32>
    %88 = arith.addf %82, %87 : vector<16x256xf32>
    %c15_i32_31 = arith.constant 15 : i32
    %89 = tpu.dynamic_rotate %1 by %c15_i32_31 dim 1 : vector<3x256xf32>, i32 -> vector<3x256xf32>
    %90 = vector.broadcast %32 : vector<1x256xf32> to vector<3x256xf32>
    %91 = arith.mulf %89, %90 : vector<3x256xf32>
    %92 = vector.extract_strided_slice %74 {offsets = [0, 6], sizes = [16, 3], strides = [1, 1]} : vector<16x27xf32> to vector<16x3xf32>
    %cst_32 = arith.constant dense<0.000000e+00> : vector<16x256xf32>
    %93 = tpu.matmul %92, %91, %cst_32 {dimension_numbers = #tpu.dot_dimension_numbers<[1], [0], [0], [1], [0, 0, 1, 1], [], []>} : vector<16x3xf32>, vector<3x256xf32>, vector<16x256xf32> -> vector<16x256xf32>
    %94 = arith.addf %88, %93 : vector<16x256xf32>
    %c1_i32_33 = arith.constant 1 : i32
    %95 = tpu.dynamic_rotate %1 by %c1_i32_33 dim 1 : vector<3x256xf32>, i32 -> vector<3x256xf32>
    %96 = vector.broadcast %33 : vector<1x256xf32> to vector<3x256xf32>
    %97 = arith.mulf %95, %96 : vector<3x256xf32>
    %98 = vector.extract_strided_slice %74 {offsets = [0, 9], sizes = [16, 3], strides = [1, 1]} : vector<16x27xf32> to vector<16x3xf32>
    %cst_34 = arith.constant dense<0.000000e+00> : vector<16x256xf32>
    %99 = tpu.matmul %98, %97, %cst_34 {dimension_numbers = #tpu.dot_dimension_numbers<[1], [0], [0], [1], [0, 0, 1, 1], [], []>} : vector<16x3xf32>, vector<3x256xf32>, vector<16x256xf32> -> vector<16x256xf32>
    %100 = arith.addf %94, %99 : vector<16x256xf32>
    %101 = vector.extract_strided_slice %74 {offsets = [0, 12], sizes = [16, 3], strides = [1, 1]} : vector<16x27xf32> to vector<16x3xf32>
    %cst_35 = arith.constant dense<0.000000e+00> : vector<16x256xf32>
    %102 = tpu.matmul %101, %1, %cst_35 {dimension_numbers = #tpu.dot_dimension_numbers<[1], [0], [0], [1], [0, 0, 1, 1], [], []>} : vector<16x3xf32>, vector<3x256xf32>, vector<16x256xf32> -> vector<16x256xf32>
    %103 = arith.addf %100, %102 : vector<16x256xf32>
    %c255_i32_36 = arith.constant 255 : i32
    %104 = tpu.dynamic_rotate %1 by %c255_i32_36 dim 1 : vector<3x256xf32>, i32 -> vector<3x256xf32>
    %105 = vector.broadcast %34 : vector<1x256xf32> to vector<3x256xf32>
    %106 = arith.mulf %104, %105 : vector<3x256xf32>
    %107 = vector.extract_strided_slice %74 {offsets = [0, 15], sizes = [16, 3], strides = [1, 1]} : vector<16x27xf32> to vector<16x3xf32>
    %cst_37 = arith.constant dense<0.000000e+00> : vector<16x256xf32>
    %108 = tpu.matmul %107, %106, %cst_37 {dimension_numbers = #tpu.dot_dimension_numbers<[1], [0], [0], [1], [0, 0, 1, 1], [], []>} : vector<16x3xf32>, vector<3x256xf32>, vector<16x256xf32> -> vector<16x256xf32>
    %109 = arith.addf %103, %108 : vector<16x256xf32>
    %c241_i32 = arith.constant 241 : i32
    %110 = tpu.dynamic_rotate %1 by %c241_i32 dim 1 : vector<3x256xf32>, i32 -> vector<3x256xf32>
    %111 = vector.broadcast %35 : vector<1x256xf32> to vector<3x256xf32>
    %112 = arith.mulf %110, %111 : vector<3x256xf32>
    %113 = vector.extract_strided_slice %74 {offsets = [0, 18], sizes = [16, 3], strides = [1, 1]} : vector<16x27xf32> to vector<16x3xf32>
    %cst_38 = arith.constant dense<0.000000e+00> : vector<16x256xf32>
    %114 = tpu.matmul %113, %112, %cst_38 {dimension_numbers = #tpu.dot_dimension_numbers<[1], [0], [0], [1], [0, 0, 1, 1], [], []>} : vector<16x3xf32>, vector<3x256xf32>, vector<16x256xf32> -> vector<16x256xf32>
    %115 = arith.addf %109, %114 : vector<16x256xf32>
    %c240_i32 = arith.constant 240 : i32
    %116 = tpu.dynamic_rotate %1 by %c240_i32 dim 1 : vector<3x256xf32>, i32 -> vector<3x256xf32>
    %117 = vector.broadcast %36 : vector<1x256xf32> to vector<3x256xf32>
    %118 = arith.mulf %116, %117 : vector<3x256xf32>
    %119 = vector.extract_strided_slice %74 {offsets = [0, 21], sizes = [16, 3], strides = [1, 1]} : vector<16x27xf32> to vector<16x3xf32>
    %cst_39 = arith.constant dense<0.000000e+00> : vector<16x256xf32>
    %120 = tpu.matmul %119, %118, %cst_39 {dimension_numbers = #tpu.dot_dimension_numbers<[1], [0], [0], [1], [0, 0, 1, 1], [], []>} : vector<16x3xf32>, vector<3x256xf32>, vector<16x256xf32> -> vector<16x256xf32>
    %121 = arith.addf %115, %120 : vector<16x256xf32>
    %c239_i32 = arith.constant 239 : i32
    %122 = tpu.dynamic_rotate %1 by %c239_i32 dim 1 : vector<3x256xf32>, i32 -> vector<3x256xf32>
    %123 = vector.broadcast %37 : vector<1x256xf32> to vector<3x256xf32>
    %124 = arith.mulf %122, %123 : vector<3x256xf32>
    %125 = vector.extract_strided_slice %74 {offsets = [0, 24], sizes = [16, 3], strides = [1, 1]} : vector<16x27xf32> to vector<16x3xf32>
    %cst_40 = arith.constant dense<0.000000e+00> : vector<16x256xf32>
    %126 = tpu.matmul %125, %124, %cst_40 {dimension_numbers = #tpu.dot_dimension_numbers<[1], [0], [0], [1], [0, 0, 1, 1], [], []>} : vector<16x3xf32>, vector<3x256xf32>, vector<16x256xf32> -> vector<16x256xf32>
    %127 = arith.addf %121, %126 : vector<16x256xf32>
    %128 = vector.broadcast %75 : vector<16x1xf32> to vector<16x256xf32>
    %129 = arith.addf %127, %128 : vector<16x256xf32>
    %cst_41 = arith.constant 0.000000e+00 : f32
    %130 = vector.broadcast %cst_41 : f32 to vector<16x256xf32>
    %131 = arith.maximumf %129, %130 : vector<16x256xf32>
    %c0_42 = arith.constant 0 : index
    %c0_43 = arith.constant 0 : index
    %132 = vector.load %arg10[%c0_42, %c0_43] : memref<256x128xf32, #tpu.memory_space<vmem>>, vector<256x128xf32>
    %c255_i32_44 = arith.constant 255 : i32
    %133 = tpu.dynamic_rotate %131 by %c255_i32_44 dim 1 : vector<16x256xf32>, i32 -> vector<16x256xf32>
    %134 = arith.maximumf %131, %133 : vector<16x256xf32>
    %c240_i32_45 = arith.constant 240 : i32
    %135 = tpu.dynamic_rotate %131 by %c240_i32_45 dim 1 : vector<16x256xf32>, i32 -> vector<16x256xf32>
    %c239_i32_46 = arith.constant 239 : i32
    %136 = tpu.dynamic_rotate %131 by %c239_i32_46 dim 1 : vector<16x256xf32>, i32 -> vector<16x256xf32>
    %137 = arith.maximumf %135, %136 : vector<16x256xf32>
    %138 = arith.maximumf %134, %137 : vector<16x256xf32>
    %cst_47 = arith.constant dense<0.000000e+00> : vector<16x128xf32>
    %139 = tpu.matmul %138, %132, %cst_47 {dimension_numbers = #tpu.dot_dimension_numbers<[1], [0], [0], [1], [0, 0, 1, 1], [], []>} : vector<16x256xf32>, vector<256x128xf32>, vector<16x128xf32> -> vector<16x128xf32>
    %c0_48 = arith.constant 0 : index
    %c0_49 = arith.constant 0 : index
    %140 = vector.load %arg4[%c0_48, %c0_49] : memref<8x144xf32, #tpu.memory_space<vmem>>, vector<8x144xf32>
    %c0_50 = arith.constant 0 : index
    %c0_51 = arith.constant 0 : index
    %141 = vector.load %arg5[%c0_50, %c0_51] : memref<8x1xf32, #tpu.memory_space<vmem>>, vector<8x1xf32>
    %cst_52 = arith.constant 0.000000e+00 : f32
    %142 = vector.broadcast %cst_52 : f32 to vector<8x128xf32>
    %c9_i32 = arith.constant 9 : i32
    %143 = tpu.dynamic_rotate %139 by %c9_i32 dim 1 : vector<16x128xf32>, i32 -> vector<16x128xf32>
    %144 = vector.broadcast %66 : vector<1x128xf32> to vector<16x128xf32>
    %145 = arith.mulf %143, %144 : vector<16x128xf32>
    %146 = vector.extract_strided_slice %140 {offsets = [0, 0], sizes = [8, 16], strides = [1, 1]} : vector<8x144xf32> to vector<8x16xf32>
    %cst_53 = arith.constant dense<0.000000e+00> : vector<8x128xf32>
    %147 = tpu.matmul %146, %145, %cst_53 {dimension_numbers = #tpu.dot_dimension_numbers<[1], [0], [0], [1], [0, 0, 1, 1], [], []>} : vector<8x16xf32>, vector<16x128xf32>, vector<8x128xf32> -> vector<8x128xf32>
    %148 = arith.addf %142, %147 : vector<8x128xf32>
    %c8_i32 = arith.constant 8 : i32
    %149 = tpu.dynamic_rotate %139 by %c8_i32 dim 1 : vector<16x128xf32>, i32 -> vector<16x128xf32>
    %150 = vector.broadcast %67 : vector<1x128xf32> to vector<16x128xf32>
    %151 = arith.mulf %149, %150 : vector<16x128xf32>
    %152 = vector.extract_strided_slice %140 {offsets = [0, 16], sizes = [8, 16], strides = [1, 1]} : vector<8x144xf32> to vector<8x16xf32>
    %cst_54 = arith.constant dense<0.000000e+00> : vector<8x128xf32>
    %153 = tpu.matmul %152, %151, %cst_54 {dimension_numbers = #tpu.dot_dimension_numbers<[1], [0], [0], [1], [0, 0, 1, 1], [], []>} : vector<8x16xf32>, vector<16x128xf32>, vector<8x128xf32> -> vector<8x128xf32>
    %154 = arith.addf %148, %153 : vector<8x128xf32>
    %c7_i32_55 = arith.constant 7 : i32
    %155 = tpu.dynamic_rotate %139 by %c7_i32_55 dim 1 : vector<16x128xf32>, i32 -> vector<16x128xf32>
    %156 = vector.broadcast %68 : vector<1x128xf32> to vector<16x128xf32>
    %157 = arith.mulf %155, %156 : vector<16x128xf32>
    %158 = vector.extract_strided_slice %140 {offsets = [0, 32], sizes = [8, 16], strides = [1, 1]} : vector<8x144xf32> to vector<8x16xf32>
    %cst_56 = arith.constant dense<0.000000e+00> : vector<8x128xf32>
    %159 = tpu.matmul %158, %157, %cst_56 {dimension_numbers = #tpu.dot_dimension_numbers<[1], [0], [0], [1], [0, 0, 1, 1], [], []>} : vector<8x16xf32>, vector<16x128xf32>, vector<8x128xf32> -> vector<8x128xf32>
    %160 = arith.addf %154, %159 : vector<8x128xf32>
    %c1_i32_57 = arith.constant 1 : i32
    %161 = tpu.dynamic_rotate %139 by %c1_i32_57 dim 1 : vector<16x128xf32>, i32 -> vector<16x128xf32>
    %162 = vector.broadcast %69 : vector<1x128xf32> to vector<16x128xf32>
    %163 = arith.mulf %161, %162 : vector<16x128xf32>
    %164 = vector.extract_strided_slice %140 {offsets = [0, 48], sizes = [8, 16], strides = [1, 1]} : vector<8x144xf32> to vector<8x16xf32>
    %cst_58 = arith.constant dense<0.000000e+00> : vector<8x128xf32>
    %165 = tpu.matmul %164, %163, %cst_58 {dimension_numbers = #tpu.dot_dimension_numbers<[1], [0], [0], [1], [0, 0, 1, 1], [], []>} : vector<8x16xf32>, vector<16x128xf32>, vector<8x128xf32> -> vector<8x128xf32>
    %166 = arith.addf %160, %165 : vector<8x128xf32>
    %167 = vector.extract_strided_slice %140 {offsets = [0, 64], sizes = [8, 16], strides = [1, 1]} : vector<8x144xf32> to vector<8x16xf32>
    %cst_59 = arith.constant dense<0.000000e+00> : vector<8x128xf32>
    %168 = tpu.matmul %167, %139, %cst_59 {dimension_numbers = #tpu.dot_dimension_numbers<[1], [0], [0], [1], [0, 0, 1, 1], [], []>} : vector<8x16xf32>, vector<16x128xf32>, vector<8x128xf32> -> vector<8x128xf32>
    %169 = arith.addf %166, %168 : vector<8x128xf32>
    %c127_i32 = arith.constant 127 : i32
    %170 = tpu.dynamic_rotate %139 by %c127_i32 dim 1 : vector<16x128xf32>, i32 -> vector<16x128xf32>
    %171 = vector.broadcast %70 : vector<1x128xf32> to vector<16x128xf32>
    %172 = arith.mulf %170, %171 : vector<16x128xf32>
    %173 = vector.extract_strided_slice %140 {offsets = [0, 80], sizes = [8, 16], strides = [1, 1]} : vector<8x144xf32> to vector<8x16xf32>
    %cst_60 = arith.constant dense<0.000000e+00> : vector<8x128xf32>
    %174 = tpu.matmul %173, %172, %cst_60 {dimension_numbers = #tpu.dot_dimension_numbers<[1], [0], [0], [1], [0, 0, 1, 1], [], []>} : vector<8x16xf32>, vector<16x128xf32>, vector<8x128xf32> -> vector<8x128xf32>
    %175 = arith.addf %169, %174 : vector<8x128xf32>
    %c121_i32 = arith.constant 121 : i32
    %176 = tpu.dynamic_rotate %139 by %c121_i32 dim 1 : vector<16x128xf32>, i32 -> vector<16x128xf32>
    %177 = vector.broadcast %71 : vector<1x128xf32> to vector<16x128xf32>
    %178 = arith.mulf %176, %177 : vector<16x128xf32>
    %179 = vector.extract_strided_slice %140 {offsets = [0, 96], sizes = [8, 16], strides = [1, 1]} : vector<8x144xf32> to vector<8x16xf32>
    %cst_61 = arith.constant dense<0.000000e+00> : vector<8x128xf32>
    %180 = tpu.matmul %179, %178, %cst_61 {dimension_numbers = #tpu.dot_dimension_numbers<[1], [0], [0], [1], [0, 0, 1, 1], [], []>} : vector<8x16xf32>, vector<16x128xf32>, vector<8x128xf32> -> vector<8x128xf32>
    %181 = arith.addf %175, %180 : vector<8x128xf32>
    %c120_i32 = arith.constant 120 : i32
    %182 = tpu.dynamic_rotate %139 by %c120_i32 dim 1 : vector<16x128xf32>, i32 -> vector<16x128xf32>
    %183 = vector.broadcast %72 : vector<1x128xf32> to vector<16x128xf32>
    %184 = arith.mulf %182, %183 : vector<16x128xf32>
    %185 = vector.extract_strided_slice %140 {offsets = [0, 112], sizes = [8, 16], strides = [1, 1]} : vector<8x144xf32> to vector<8x16xf32>
    %cst_62 = arith.constant dense<0.000000e+00> : vector<8x128xf32>
    %186 = tpu.matmul %185, %184, %cst_62 {dimension_numbers = #tpu.dot_dimension_numbers<[1], [0], [0], [1], [0, 0, 1, 1], [], []>} : vector<8x16xf32>, vector<16x128xf32>, vector<8x128xf32> -> vector<8x128xf32>
    %187 = arith.addf %181, %186 : vector<8x128xf32>
    %c119_i32 = arith.constant 119 : i32
    %188 = tpu.dynamic_rotate %139 by %c119_i32 dim 1 : vector<16x128xf32>, i32 -> vector<16x128xf32>
    %189 = vector.broadcast %73 : vector<1x128xf32> to vector<16x128xf32>
    %190 = arith.mulf %188, %189 : vector<16x128xf32>
    %191 = vector.extract_strided_slice %140 {offsets = [0, 128], sizes = [8, 16], strides = [1, 1]} : vector<8x144xf32> to vector<8x16xf32>
    %cst_63 = arith.constant dense<0.000000e+00> : vector<8x128xf32>
    %192 = tpu.matmul %191, %190, %cst_63 {dimension_numbers = #tpu.dot_dimension_numbers<[1], [0], [0], [1], [0, 0, 1, 1], [], []>} : vector<8x16xf32>, vector<16x128xf32>, vector<8x128xf32> -> vector<8x128xf32>
    %193 = arith.addf %187, %192 : vector<8x128xf32>
    %194 = vector.broadcast %141 : vector<8x1xf32> to vector<8x128xf32>
    %195 = arith.addf %193, %194 : vector<8x128xf32>
    %cst_64 = arith.constant 0.000000e+00 : f32
    %196 = vector.broadcast %cst_64 : f32 to vector<8x128xf32>
    %197 = arith.maximumf %195, %196 : vector<8x128xf32>
    %c0_65 = arith.constant 0 : index
    %c0_66 = arith.constant 0 : index
    %198 = vector.load %arg11[%c0_65, %c0_66] : memref<128x128xf32, #tpu.memory_space<vmem>>, vector<128x128xf32>
    %c127_i32_67 = arith.constant 127 : i32
    %199 = tpu.dynamic_rotate %197 by %c127_i32_67 dim 1 : vector<8x128xf32>, i32 -> vector<8x128xf32>
    %200 = arith.maximumf %197, %199 : vector<8x128xf32>
    %c120_i32_68 = arith.constant 120 : i32
    %201 = tpu.dynamic_rotate %197 by %c120_i32_68 dim 1 : vector<8x128xf32>, i32 -> vector<8x128xf32>
    %c119_i32_69 = arith.constant 119 : i32
    %202 = tpu.dynamic_rotate %197 by %c119_i32_69 dim 1 : vector<8x128xf32>, i32 -> vector<8x128xf32>
    %203 = arith.maximumf %201, %202 : vector<8x128xf32>
    %204 = arith.maximumf %200, %203 : vector<8x128xf32>
    %cst_70 = arith.constant dense<0.000000e+00> : vector<8x128xf32>
    %205 = tpu.matmul %204, %198, %cst_70 {dimension_numbers = #tpu.dot_dimension_numbers<[1], [0], [0], [1], [0, 0, 1, 1], [], []>} : vector<8x128xf32>, vector<128x128xf32>, vector<8x128xf32> -> vector<8x128xf32>
    %c0_71 = arith.constant 0 : index
    %c0_72 = arith.constant 0 : index
    %206 = vector.load %arg12[%c0_71, %c0_72] : memref<128x128xf32, #tpu.memory_space<vmem>>, vector<128x128xf32>
    %cst_73 = arith.constant dense<0.000000e+00> : vector<8x128xf32>
    %207 = tpu.matmul %205, %206, %cst_73 {dimension_numbers = #tpu.dot_dimension_numbers<[1], [0], [0], [1], [0, 0, 1, 1], [], []>} : vector<8x128xf32>, vector<128x128xf32>, vector<8x128xf32> -> vector<8x128xf32>
    %c0_74 = arith.constant 0 : index
    %c0_75 = arith.constant 0 : index
    %208 = vector.load %arg6[%c0_74, %c0_75] : memref<16x72xf32, #tpu.memory_space<vmem>>, vector<16x72xf32>
    %c0_76 = arith.constant 0 : index
    %c0_77 = arith.constant 0 : index
    %209 = vector.load %arg7[%c0_76, %c0_77] : memref<16x1xf32, #tpu.memory_space<vmem>>, vector<16x1xf32>
    %cst_78 = arith.constant 0.000000e+00 : f32
    %210 = vector.broadcast %cst_78 : f32 to vector<16x128xf32>
    %c9_i32_79 = arith.constant 9 : i32
    %211 = tpu.dynamic_rotate %207 by %c9_i32_79 dim 1 : vector<8x128xf32>, i32 -> vector<8x128xf32>
    %212 = vector.broadcast %66 : vector<1x128xf32> to vector<8x128xf32>
    %213 = arith.mulf %211, %212 : vector<8x128xf32>
    %214 = vector.extract_strided_slice %208 {offsets = [0, 0], sizes = [16, 8], strides = [1, 1]} : vector<16x72xf32> to vector<16x8xf32>
    %cst_80 = arith.constant dense<0.000000e+00> : vector<16x128xf32>
    %215 = tpu.matmul %214, %213, %cst_80 {dimension_numbers = #tpu.dot_dimension_numbers<[1], [0], [0], [1], [0, 0, 1, 1], [], []>} : vector<16x8xf32>, vector<8x128xf32>, vector<16x128xf32> -> vector<16x128xf32>
    %216 = arith.addf %210, %215 : vector<16x128xf32>
    %c8_i32_81 = arith.constant 8 : i32
    %217 = tpu.dynamic_rotate %207 by %c8_i32_81 dim 1 : vector<8x128xf32>, i32 -> vector<8x128xf32>
    %218 = vector.broadcast %67 : vector<1x128xf32> to vector<8x128xf32>
    %219 = arith.mulf %217, %218 : vector<8x128xf32>
    %220 = vector.extract_strided_slice %208 {offsets = [0, 8], sizes = [16, 8], strides = [1, 1]} : vector<16x72xf32> to vector<16x8xf32>
    %cst_82 = arith.constant dense<0.000000e+00> : vector<16x128xf32>
    %221 = tpu.matmul %220, %219, %cst_82 {dimension_numbers = #tpu.dot_dimension_numbers<[1], [0], [0], [1], [0, 0, 1, 1], [], []>} : vector<16x8xf32>, vector<8x128xf32>, vector<16x128xf32> -> vector<16x128xf32>
    %222 = arith.addf %216, %221 : vector<16x128xf32>
    %c7_i32_83 = arith.constant 7 : i32
    %223 = tpu.dynamic_rotate %207 by %c7_i32_83 dim 1 : vector<8x128xf32>, i32 -> vector<8x128xf32>
    %224 = vector.broadcast %68 : vector<1x128xf32> to vector<8x128xf32>
    %225 = arith.mulf %223, %224 : vector<8x128xf32>
    %226 = vector.extract_strided_slice %208 {offsets = [0, 16], sizes = [16, 8], strides = [1, 1]} : vector<16x72xf32> to vector<16x8xf32>
    %cst_84 = arith.constant dense<0.000000e+00> : vector<16x128xf32>
    %227 = tpu.matmul %226, %225, %cst_84 {dimension_numbers = #tpu.dot_dimension_numbers<[1], [0], [0], [1], [0, 0, 1, 1], [], []>} : vector<16x8xf32>, vector<8x128xf32>, vector<16x128xf32> -> vector<16x128xf32>
    %228 = arith.addf %222, %227 : vector<16x128xf32>
    %c1_i32_85 = arith.constant 1 : i32
    %229 = tpu.dynamic_rotate %207 by %c1_i32_85 dim 1 : vector<8x128xf32>, i32 -> vector<8x128xf32>
    %230 = vector.broadcast %69 : vector<1x128xf32> to vector<8x128xf32>
    %231 = arith.mulf %229, %230 : vector<8x128xf32>
    %232 = vector.extract_strided_slice %208 {offsets = [0, 24], sizes = [16, 8], strides = [1, 1]} : vector<16x72xf32> to vector<16x8xf32>
    %cst_86 = arith.constant dense<0.000000e+00> : vector<16x128xf32>
    %233 = tpu.matmul %232, %231, %cst_86 {dimension_numbers = #tpu.dot_dimension_numbers<[1], [0], [0], [1], [0, 0, 1, 1], [], []>} : vector<16x8xf32>, vector<8x128xf32>, vector<16x128xf32> -> vector<16x128xf32>
    %234 = arith.addf %228, %233 : vector<16x128xf32>
    %235 = vector.extract_strided_slice %208 {offsets = [0, 32], sizes = [16, 8], strides = [1, 1]} : vector<16x72xf32> to vector<16x8xf32>
    %cst_87 = arith.constant dense<0.000000e+00> : vector<16x128xf32>
    %236 = tpu.matmul %235, %207, %cst_87 {dimension_numbers = #tpu.dot_dimension_numbers<[1], [0], [0], [1], [0, 0, 1, 1], [], []>} : vector<16x8xf32>, vector<8x128xf32>, vector<16x128xf32> -> vector<16x128xf32>
    %237 = arith.addf %234, %236 : vector<16x128xf32>
    %c127_i32_88 = arith.constant 127 : i32
    %238 = tpu.dynamic_rotate %207 by %c127_i32_88 dim 1 : vector<8x128xf32>, i32 -> vector<8x128xf32>
    %239 = vector.broadcast %70 : vector<1x128xf32> to vector<8x128xf32>
    %240 = arith.mulf %238, %239 : vector<8x128xf32>
    %241 = vector.extract_strided_slice %208 {offsets = [0, 40], sizes = [16, 8], strides = [1, 1]} : vector<16x72xf32> to vector<16x8xf32>
    %cst_89 = arith.constant dense<0.000000e+00> : vector<16x128xf32>
    %242 = tpu.matmul %241, %240, %cst_89 {dimension_numbers = #tpu.dot_dimension_numbers<[1], [0], [0], [1], [0, 0, 1, 1], [], []>} : vector<16x8xf32>, vector<8x128xf32>, vector<16x128xf32> -> vector<16x128xf32>
    %243 = arith.addf %237, %242 : vector<16x128xf32>
    %c121_i32_90 = arith.constant 121 : i32
    %244 = tpu.dynamic_rotate %207 by %c121_i32_90 dim 1 : vector<8x128xf32>, i32 -> vector<8x128xf32>
    %245 = vector.broadcast %71 : vector<1x128xf32> to vector<8x128xf32>
    %246 = arith.mulf %244, %245 : vector<8x128xf32>
    %247 = vector.extract_strided_slice %208 {offsets = [0, 48], sizes = [16, 8], strides = [1, 1]} : vector<16x72xf32> to vector<16x8xf32>
    %cst_91 = arith.constant dense<0.000000e+00> : vector<16x128xf32>
    %248 = tpu.matmul %247, %246, %cst_91 {dimension_numbers = #tpu.dot_dimension_numbers<[1], [0], [0], [1], [0, 0, 1, 1], [], []>} : vector<16x8xf32>, vector<8x128xf32>, vector<16x128xf32> -> vector<16x128xf32>
    %249 = arith.addf %243, %248 : vector<16x128xf32>
    %c120_i32_92 = arith.constant 120 : i32
    %250 = tpu.dynamic_rotate %207 by %c120_i32_92 dim 1 : vector<8x128xf32>, i32 -> vector<8x128xf32>
    %251 = vector.broadcast %72 : vector<1x128xf32> to vector<8x128xf32>
    %252 = arith.mulf %250, %251 : vector<8x128xf32>
    %253 = vector.extract_strided_slice %208 {offsets = [0, 56], sizes = [16, 8], strides = [1, 1]} : vector<16x72xf32> to vector<16x8xf32>
    %cst_93 = arith.constant dense<0.000000e+00> : vector<16x128xf32>
    %254 = tpu.matmul %253, %252, %cst_93 {dimension_numbers = #tpu.dot_dimension_numbers<[1], [0], [0], [1], [0, 0, 1, 1], [], []>} : vector<16x8xf32>, vector<8x128xf32>, vector<16x128xf32> -> vector<16x128xf32>
    %255 = arith.addf %249, %254 : vector<16x128xf32>
    %c119_i32_94 = arith.constant 119 : i32
    %256 = tpu.dynamic_rotate %207 by %c119_i32_94 dim 1 : vector<8x128xf32>, i32 -> vector<8x128xf32>
    %257 = vector.broadcast %73 : vector<1x128xf32> to vector<8x128xf32>
    %258 = arith.mulf %256, %257 : vector<8x128xf32>
    %259 = vector.extract_strided_slice %208 {offsets = [0, 64], sizes = [16, 8], strides = [1, 1]} : vector<16x72xf32> to vector<16x8xf32>
    %cst_95 = arith.constant dense<0.000000e+00> : vector<16x128xf32>
    %260 = tpu.matmul %259, %258, %cst_95 {dimension_numbers = #tpu.dot_dimension_numbers<[1], [0], [0], [1], [0, 0, 1, 1], [], []>} : vector<16x8xf32>, vector<8x128xf32>, vector<16x128xf32> -> vector<16x128xf32>
    %261 = arith.addf %255, %260 : vector<16x128xf32>
    %262 = vector.broadcast %209 : vector<16x1xf32> to vector<16x128xf32>
    %263 = arith.addf %261, %262 : vector<16x128xf32>
    %cst_96 = arith.constant 0.000000e+00 : f32
    %264 = vector.broadcast %cst_96 : f32 to vector<16x128xf32>
    %265 = arith.maximumf %263, %264 : vector<16x128xf32>
    %c0_97 = arith.constant 0 : index
    %c0_98 = arith.constant 0 : index
    %266 = vector.load %arg13[%c0_97, %c0_98] : memref<128x256xf32, #tpu.memory_space<vmem>>, vector<128x256xf32>
    %cst_99 = arith.constant dense<0.000000e+00> : vector<16x256xf32>
    %267 = tpu.matmul %265, %266, %cst_99 {dimension_numbers = #tpu.dot_dimension_numbers<[1], [0], [0], [1], [0, 0, 1, 1], [], []>} : vector<16x128xf32>, vector<128x256xf32>, vector<16x256xf32> -> vector<16x256xf32>
    %c0_100 = arith.constant 0 : index
    %c0_101 = arith.constant 0 : index
    %268 = vector.load %arg8[%c0_100, %c0_101] : memref<3x144xf32, #tpu.memory_space<vmem>>, vector<3x144xf32>
    %c0_102 = arith.constant 0 : index
    %c0_103 = arith.constant 0 : index
    %269 = vector.load %arg9[%c0_102, %c0_103] : memref<3x1xf32, #tpu.memory_space<vmem>>, vector<3x1xf32>
    %cst_104 = arith.constant 0.000000e+00 : f32
    %270 = vector.broadcast %cst_104 : f32 to vector<3x256xf32>
    %c17_i32_105 = arith.constant 17 : i32
    %271 = tpu.dynamic_rotate %267 by %c17_i32_105 dim 1 : vector<16x256xf32>, i32 -> vector<16x256xf32>
    %272 = vector.broadcast %30 : vector<1x256xf32> to vector<16x256xf32>
    %273 = arith.mulf %271, %272 : vector<16x256xf32>
    %274 = vector.extract_strided_slice %268 {offsets = [0, 0], sizes = [3, 16], strides = [1, 1]} : vector<3x144xf32> to vector<3x16xf32>
    %cst_106 = arith.constant dense<0.000000e+00> : vector<3x256xf32>
    %275 = tpu.matmul %274, %273, %cst_106 {dimension_numbers = #tpu.dot_dimension_numbers<[1], [0], [0], [1], [0, 0, 1, 1], [], []>} : vector<3x16xf32>, vector<16x256xf32>, vector<3x256xf32> -> vector<3x256xf32>
    %276 = arith.addf %270, %275 : vector<3x256xf32>
    %c16_i32_107 = arith.constant 16 : i32
    %277 = tpu.dynamic_rotate %267 by %c16_i32_107 dim 1 : vector<16x256xf32>, i32 -> vector<16x256xf32>
    %278 = vector.broadcast %31 : vector<1x256xf32> to vector<16x256xf32>
    %279 = arith.mulf %277, %278 : vector<16x256xf32>
    %280 = vector.extract_strided_slice %268 {offsets = [0, 16], sizes = [3, 16], strides = [1, 1]} : vector<3x144xf32> to vector<3x16xf32>
    %cst_108 = arith.constant dense<0.000000e+00> : vector<3x256xf32>
    %281 = tpu.matmul %280, %279, %cst_108 {dimension_numbers = #tpu.dot_dimension_numbers<[1], [0], [0], [1], [0, 0, 1, 1], [], []>} : vector<3x16xf32>, vector<16x256xf32>, vector<3x256xf32> -> vector<3x256xf32>
    %282 = arith.addf %276, %281 : vector<3x256xf32>
    %c15_i32_109 = arith.constant 15 : i32
    %283 = tpu.dynamic_rotate %267 by %c15_i32_109 dim 1 : vector<16x256xf32>, i32 -> vector<16x256xf32>
    %284 = vector.broadcast %32 : vector<1x256xf32> to vector<16x256xf32>
    %285 = arith.mulf %283, %284 : vector<16x256xf32>
    %286 = vector.extract_strided_slice %268 {offsets = [0, 32], sizes = [3, 16], strides = [1, 1]} : vector<3x144xf32> to vector<3x16xf32>
    %cst_110 = arith.constant dense<0.000000e+00> : vector<3x256xf32>
    %287 = tpu.matmul %286, %285, %cst_110 {dimension_numbers = #tpu.dot_dimension_numbers<[1], [0], [0], [1], [0, 0, 1, 1], [], []>} : vector<3x16xf32>, vector<16x256xf32>, vector<3x256xf32> -> vector<3x256xf32>
    %288 = arith.addf %282, %287 : vector<3x256xf32>
    %c1_i32_111 = arith.constant 1 : i32
    %289 = tpu.dynamic_rotate %267 by %c1_i32_111 dim 1 : vector<16x256xf32>, i32 -> vector<16x256xf32>
    %290 = vector.broadcast %33 : vector<1x256xf32> to vector<16x256xf32>
    %291 = arith.mulf %289, %290 : vector<16x256xf32>
    %292 = vector.extract_strided_slice %268 {offsets = [0, 48], sizes = [3, 16], strides = [1, 1]} : vector<3x144xf32> to vector<3x16xf32>
    %cst_112 = arith.constant dense<0.000000e+00> : vector<3x256xf32>
    %293 = tpu.matmul %292, %291, %cst_112 {dimension_numbers = #tpu.dot_dimension_numbers<[1], [0], [0], [1], [0, 0, 1, 1], [], []>} : vector<3x16xf32>, vector<16x256xf32>, vector<3x256xf32> -> vector<3x256xf32>
    %294 = arith.addf %288, %293 : vector<3x256xf32>
    %295 = vector.extract_strided_slice %268 {offsets = [0, 64], sizes = [3, 16], strides = [1, 1]} : vector<3x144xf32> to vector<3x16xf32>
    %cst_113 = arith.constant dense<0.000000e+00> : vector<3x256xf32>
    %296 = tpu.matmul %295, %267, %cst_113 {dimension_numbers = #tpu.dot_dimension_numbers<[1], [0], [0], [1], [0, 0, 1, 1], [], []>} : vector<3x16xf32>, vector<16x256xf32>, vector<3x256xf32> -> vector<3x256xf32>
    %297 = arith.addf %294, %296 : vector<3x256xf32>
    %c255_i32_114 = arith.constant 255 : i32
    %298 = tpu.dynamic_rotate %267 by %c255_i32_114 dim 1 : vector<16x256xf32>, i32 -> vector<16x256xf32>
    %299 = vector.broadcast %34 : vector<1x256xf32> to vector<16x256xf32>
    %300 = arith.mulf %298, %299 : vector<16x256xf32>
    %301 = vector.extract_strided_slice %268 {offsets = [0, 80], sizes = [3, 16], strides = [1, 1]} : vector<3x144xf32> to vector<3x16xf32>
    %cst_115 = arith.constant dense<0.000000e+00> : vector<3x256xf32>
    %302 = tpu.matmul %301, %300, %cst_115 {dimension_numbers = #tpu.dot_dimension_numbers<[1], [0], [0], [1], [0, 0, 1, 1], [], []>} : vector<3x16xf32>, vector<16x256xf32>, vector<3x256xf32> -> vector<3x256xf32>
    %303 = arith.addf %297, %302 : vector<3x256xf32>
    %c241_i32_116 = arith.constant 241 : i32
    %304 = tpu.dynamic_rotate %267 by %c241_i32_116 dim 1 : vector<16x256xf32>, i32 -> vector<16x256xf32>
    %305 = vector.broadcast %35 : vector<1x256xf32> to vector<16x256xf32>
    %306 = arith.mulf %304, %305 : vector<16x256xf32>
    %307 = vector.extract_strided_slice %268 {offsets = [0, 96], sizes = [3, 16], strides = [1, 1]} : vector<3x144xf32> to vector<3x16xf32>
    %cst_117 = arith.constant dense<0.000000e+00> : vector<3x256xf32>
    %308 = tpu.matmul %307, %306, %cst_117 {dimension_numbers = #tpu.dot_dimension_numbers<[1], [0], [0], [1], [0, 0, 1, 1], [], []>} : vector<3x16xf32>, vector<16x256xf32>, vector<3x256xf32> -> vector<3x256xf32>
    %309 = arith.addf %303, %308 : vector<3x256xf32>
    %c240_i32_118 = arith.constant 240 : i32
    %310 = tpu.dynamic_rotate %267 by %c240_i32_118 dim 1 : vector<16x256xf32>, i32 -> vector<16x256xf32>
    %311 = vector.broadcast %36 : vector<1x256xf32> to vector<16x256xf32>
    %312 = arith.mulf %310, %311 : vector<16x256xf32>
    %313 = vector.extract_strided_slice %268 {offsets = [0, 112], sizes = [3, 16], strides = [1, 1]} : vector<3x144xf32> to vector<3x16xf32>
    %cst_119 = arith.constant dense<0.000000e+00> : vector<3x256xf32>
    %314 = tpu.matmul %313, %312, %cst_119 {dimension_numbers = #tpu.dot_dimension_numbers<[1], [0], [0], [1], [0, 0, 1, 1], [], []>} : vector<3x16xf32>, vector<16x256xf32>, vector<3x256xf32> -> vector<3x256xf32>
    %315 = arith.addf %309, %314 : vector<3x256xf32>
    %c239_i32_120 = arith.constant 239 : i32
    %316 = tpu.dynamic_rotate %267 by %c239_i32_120 dim 1 : vector<16x256xf32>, i32 -> vector<16x256xf32>
    %317 = vector.broadcast %37 : vector<1x256xf32> to vector<16x256xf32>
    %318 = arith.mulf %316, %317 : vector<16x256xf32>
    %319 = vector.extract_strided_slice %268 {offsets = [0, 128], sizes = [3, 16], strides = [1, 1]} : vector<3x144xf32> to vector<3x16xf32>
    %cst_121 = arith.constant dense<0.000000e+00> : vector<3x256xf32>
    %320 = tpu.matmul %319, %318, %cst_121 {dimension_numbers = #tpu.dot_dimension_numbers<[1], [0], [0], [1], [0, 0, 1, 1], [], []>} : vector<3x16xf32>, vector<16x256xf32>, vector<3x256xf32> -> vector<3x256xf32>
    %321 = arith.addf %315, %320 : vector<3x256xf32>
    %322 = vector.broadcast %269 : vector<3x1xf32> to vector<3x256xf32>
    %323 = arith.addf %321, %322 : vector<3x256xf32>
    %cst_122 = arith.constant 5.000000e-01 : f32
    %324 = vector.broadcast %cst_122 : f32 to vector<3x256xf32>
    %325 = arith.mulf %324, %323 : vector<3x256xf32>
    %326 = math.tanh %325 : vector<3x256xf32>
    %cst_123 = arith.constant 1.000000e+00 : f32
    %327 = vector.broadcast %cst_123 : f32 to vector<3x256xf32>
    %328 = arith.addf %326, %327 : vector<3x256xf32>
    %cst_124 = arith.constant 5.000000e-01 : f32
    %329 = vector.broadcast %cst_124 : f32 to vector<3x256xf32>
    %330 = arith.mulf %329, %328 : vector<3x256xf32>
    %c0_125 = arith.constant 0 : index
    %c0_126 = arith.constant 0 : index
    %c0_127 = arith.constant 0 : index
    %331 = vector.load %arg14[%c0_125, %c0_126, %c0_127] : memref<1x3x256xf32, #tpu.memory_space<vmem>>, vector<1x3x256xf32>
    %332 = vector.shape_cast %331 : vector<1x3x256xf32> to vector<3x256xf32>
    %333 = vector.shape_cast %330 : vector<3x256xf32> to vector<1x3x256xf32>
    tpu.vector_store %arg14[%c0_125, %c0_126, %c0_127], %333 {strides = array<i32>} : memref<1x3x256xf32, #tpu.memory_space<vmem>>, vector<1x3x256xf32>,
    return
  }
  func.func @transform_0(%arg0: i32) -> (i32, i32, i32) {
    %c0_i32 = arith.constant 0 : i32
    %c0_i32_0 = arith.constant 0 : i32
    %c0_i32_1 = arith.constant 0 : i32
    return %arg0, %c0_i32, %c0_i32_0 : i32, i32, i32
  }
  func.func @transform_1(%arg0: i32) -> (i32, i32) {
    %c0_i32 = arith.constant 0 : i32
    %c0_i32_0 = arith.constant 0 : i32
    %c0_i32_1 = arith.constant 0 : i32
    return %c0_i32, %c0_i32_0 : i32, i32
  }
  func.func @transform_2(%arg0: i32) -> (i32, i32) {
    %c0_i32 = arith.constant 0 : i32
    %c0_i32_0 = arith.constant 0 : i32
    %c0_i32_1 = arith.constant 0 : i32
    return %c0_i32, %c0_i32_0 : i32, i32
  }
  func.func @transform_3(%arg0: i32) -> (i32, i32) {
    %c0_i32 = arith.constant 0 : i32
    %c0_i32_0 = arith.constant 0 : i32
    %c0_i32_1 = arith.constant 0 : i32
    return %c0_i32, %c0_i32_0 : i32, i32
  }
  func.func @transform_4(%arg0: i32) -> (i32, i32) {
    %c0_i32 = arith.constant 0 : i32
    %c0_i32_0 = arith.constant 0 : i32
    %c0_i32_1 = arith.constant 0 : i32
    return %c0_i32, %c0_i32_0 : i32, i32
  }
  func.func @transform_5(%arg0: i32) -> (i32, i32) {
    %c0_i32 = arith.constant 0 : i32
    %c0_i32_0 = arith.constant 0 : i32
    %c0_i32_1 = arith.constant 0 : i32
    return %c0_i32, %c0_i32_0 : i32, i32
  }
  func.func @transform_6(%arg0: i32) -> (i32, i32) {
    %c0_i32 = arith.constant 0 : i32
    %c0_i32_0 = arith.constant 0 : i32
    %c0_i32_1 = arith.constant 0 : i32
    return %c0_i32, %c0_i32_0 : i32, i32
  }
  func.func @transform_7(%arg0: i32) -> (i32, i32) {
    %c0_i32 = arith.constant 0 : i32
    %c0_i32_0 = arith.constant 0 : i32
    %c0_i32_1 = arith.constant 0 : i32
    return %c0_i32, %c0_i32_0 : i32, i32
  }
  func.func @transform_8(%arg0: i32) -> (i32, i32) {
    %c0_i32 = arith.constant 0 : i32
    %c0_i32_0 = arith.constant 0 : i32
    %c0_i32_1 = arith.constant 0 : i32
    return %c0_i32, %c0_i32_0 : i32, i32
  }
  func.func @transform_9(%arg0: i32) -> (i32, i32) {
    %c0_i32 = arith.constant 0 : i32
    %c0_i32_0 = arith.constant 0 : i32
    %c0_i32_1 = arith.constant 0 : i32
    return %c0_i32, %c0_i32_0 : i32, i32
  }
  func.func @transform_10(%arg0: i32) -> (i32, i32) {
    %c0_i32 = arith.constant 0 : i32
    %c0_i32_0 = arith.constant 0 : i32
    %c0_i32_1 = arith.constant 0 : i32
    return %c0_i32, %c0_i32_0 : i32, i32
  }
  func.func @transform_11(%arg0: i32) -> (i32, i32) {
    %c0_i32 = arith.constant 0 : i32
    %c0_i32_0 = arith.constant 0 : i32
    %c0_i32_1 = arith.constant 0 : i32
    return %c0_i32, %c0_i32_0 : i32, i32
  }
  func.func @transform_12(%arg0: i32) -> (i32, i32) {
    %c0_i32 = arith.constant 0 : i32
    %c0_i32_0 = arith.constant 0 : i32
    %c0_i32_1 = arith.constant 0 : i32
    return %c0_i32, %c0_i32_0 : i32, i32
  }
  func.func @transform_13(%arg0: i32) -> (i32, i32, i32) {
    %c0_i32 = arith.constant 0 : i32
    %c0_i32_0 = arith.constant 0 : i32
    %c0_i32_1 = arith.constant 0 : i32
    return %arg0, %c0_i32, %c0_i32_0 : i32, i32, i32
  }
}

</mosaic_0001>

<bundles_post_ra>
// kernel: autoencoder_forward.1
= control target key start
LH: loop header
LB: loop body
LE: loop exit
PB: predicated region body
PF: predicated region fallthrough
CT: control target
= control target key end

     0   :  { %s6284_s0 = inlined_call_operand.vmem [shape: f32[2,3,256], index: 0, kind: input, shape index: {}]   ;;  %s6285_s1 = inlined_call_operand.vmem [shape: f32[16,27], index: 1, kind: input, shape index: {}]   ;;  %s6286_s2 = inlined_call_operand.vmem [shape: f32[16,1], index: 2, kind: input, shape index: {}]   ;;  %s6287_s3 = inlined_call_operand.vmem [shape: f32[8,144], index: 3, kind: input, shape index: {}]   ;;  %s6288_s4 = inlined_call_operand.vmem [shape: f32[8,1], index: 4, kind: input, shape index: {}]   ;;  %s6289_s5 = inlined_call_operand.vmem [shape: f32[16,72], index: 5, kind: input, shape index: {}]   ;;  %s6290_s6 = inlined_call_operand.vmem [shape: f32[16,1], index: 6, kind: input, shape index: {}]   ;;  %s6291_s7 = inlined_call_operand.vmem [shape: f32[3,144], index: 7, kind: input, shape index: {}]   ;;  %s6292_s8 = inlined_call_operand.vmem [shape: f32[3,1], index: 8, kind: input, shape index: {}]   ;;  %s6293_s9 = inlined_call_operand.hbm [shape: f32[256,128], index: 9, kind: input, shape index: {}]   ;;  %s6294_s10 = inlined_call_operand.vmem [shape: f32[128,128], index: 10, kind: input, shape index: {}]   ;;  %s6295_s11 = inlined_call_operand.hbm [shape: f32[128,128], index: 11, kind: input, shape index: {}]   ;;  %s6296_s12 = inlined_call_operand.hbm [shape: f32[128,256], index: 12, kind: input, shape index: {}]   ;;  %s6297_s13 = inlined_call_operand.vmem [shape: f32[2,3,256], index: 13, kind: output, shape index: {}]  }
   0x1   :  { %6321 = sst [smem:[#allocation10_spill]] %s6297_s13 }
   0x2   :  { %18 = vsyncpa [#allocation3], 0 }
   0x3   :  { %19 = vsyncpa [#allocation5], 0  ;;  %s5330_s25 = smov 0  }
   0x4 LB: > { %6322 = sst [smem:[#allocation9_spill]] %s5220_s25  ;;  %s5336_s26 = sadd.s32 4294967295, %s5220_s25   ;;  %s5220_s25 = sphi %s5330_s25, %s25_s25  }
   0x5   : > { %p4378_p0 = scmp.ge.s32.totalorder %s5220_s25, 1  ;;  %p334_p1 = scmp.lt.s32.totalorder %s5220_s25, 3 }
   0x6   : > { %p5032_p2 = scmp.eq.s32.totalorder %s5336_s26, 0  ;;  %s5222_s28 = smov [#allocation4]  }
   0x7   : > { %p5341_p3 = pnand %p4378_p0, %p334_p1  ;;  %s386_s29 = sshll.u32 %s5222_s28, 4  ;;  %s5345_s29 = int_to_ptr.vmem [resolvable:$true] %s386_s29 }
   0x8   : > { %s5223_s30 = smov [#allocation2]   ;;  %s5224_s16 = smov [#allocation6]  }
   0x9   : > { %p5022_p4 = pneg %p5341_p3  ;;  %s370_s14 = sshll.u32 %s5223_s30, 4  ;;  %s5349_s14 = int_to_ptr.vmem [resolvable:$true] %s370_s14 }
   0xa   : > { %s399_s17 = sshll.u32 %s5224_s16, 4  ;;  %s5122_s20 = scalar_lea.hbm %s6295_s11, 2048  ;;  %s5357_s17 = int_to_ptr.vmem [resolvable:$true] %s399_s17 }
   0xb   : > { %p5353_p5 = pnand %p5032_p2, %p5022_p4  ;;  %p5123_p6 = scmp.ne.s32.totalorder %s6295_s11, %s5122_s20 }
   0xc   : > { %p5129_p10 = scmp.lt.u32.totalorder %s5122_s20, %s6295_s11 }
   0xd   : > { %p5367_p7 = pneg %p5353_p5 }
   0xf   : > { %p5125_p8 = pnand %p5367_p7, %p5123_p6 }
  0x11   : > { %p5126_p9 = pneg %p5125_p8 }
  0x13   : > { %p5131_p11 = pnand %p5129_p10, %p5126_p9 }
  0x15   : > { %5134 = shalt.err (!%p5131_p11)
}
  0x16   : > { %s5135_s30 = scalar_lea.vmem %s5345_s29, 2048  ;;  %p5143_p1 = scmp.lt.s32.totalorder %s5345_s29, %s5345_s29 }
  0x17   : > { %p5136_p12 = scmp.ne.s32.totalorder %s5345_s29, %s5135_s30  ;;  %p5144_p4 = scmp.lt.s32.totalorder %s5135_s30, %s5135_s30 }
  0x19   : > { %p5138_p13 = pnand %p5136_p12, %p5367_p7  ;;  %p5145_p6 = por %p5144_p4, %p5143_p1 }
  0x1b   : > { %p5139_p0 = pneg %p5138_p13 }
  0x1d   : > { %p5146_p8 = pnand %p5145_p6, %p5139_p0 }
  0x1f   : > { %5149 = shalt.err (!%p5146_p8)
}
  0x20   : > { %s5225_s16 = smov 128   ;;  %s5226_s18 = smov 8  }
  0x21   : > { %5028 = dma.hbm_to_vmem [thread:$0]  (!%p5353_p5), %s6295_s11, 2048, %s5345_s29, [#allocation5], %s5225_s16, %s5225_s16, %s5226_s18  }
  0x22   : > { %s5150_s24 = scalar_lea.hbm %s6293_s9, 4096 }
  0x23   : > { %p5151_p9 = scmp.ne.s32.totalorder %s6293_s9, %s5150_s24  ;;  %p5157_p12 = scmp.lt.u32.totalorder %s5150_s24, %s6293_s9 }
  0x25   : > { %p5153_p10 = pnand %p5151_p9, %p5367_p7 }
  0x27   : > { %p5154_p11 = pneg %p5153_p10 }
  0x29   : > { %p5159_p13 = pnand %p5157_p12, %p5154_p11 }
  0x2b   : > { %5162 = shalt.err (!%p5159_p13)
}
  0x2c   : > { %s5163_s29 = scalar_lea.vmem %s5349_s14, 4096  ;;  %p5171_p6 = scmp.lt.s32.totalorder %s5349_s14, %s5349_s14 }
  0x2d   : > { %p5164_p0 = scmp.ne.s32.totalorder %s5349_s14, %s5163_s29  ;;  %p5172_p8 = scmp.lt.s32.totalorder %s5163_s29, %s5163_s29 }
  0x2f   : > { %p5166_p1 = pnand %p5164_p0, %p5367_p7  ;;  %p5173_p9 = por %p5172_p8, %p5171_p6 }
  0x31   : > { %p5167_p4 = pneg %p5166_p1 }
  0x33   : > { %p5174_p10 = pnand %p5173_p9, %p5167_p4 }
  0x35   : > { %5177 = shalt.err (!%p5174_p10)
}
  0x36   : > { %5025 = dma.hbm_to_vmem [thread:$0]  (!%p5353_p5), %s6293_s9, 4096, %s5349_s14, [#allocation3], %s5225_s16, %s5225_s16, %s5226_s18  }
  0x37   : > { %s5178_s21 = scalar_lea.hbm %s6296_s12, 4096 }
  0x38   : > { %p5179_p11 = scmp.ne.s32.totalorder %s6296_s12, %s5178_s21  ;;  %p5185_p0 = scmp.lt.u32.totalorder %s5178_s21, %s6296_s12 }
  0x3a   : > { %p5181_p12 = pnand %p5179_p11, %p5367_p7 }
  0x3c   : > { %p5182_p13 = pneg %p5181_p12 }
  0x3e   : > { %p5187_p1 = pnand %p5185_p0, %p5182_p13 }
  0x40   : > { %5190 = shalt.err (!%p5187_p1)
}
  0x41   : > { %s5191_s14 = scalar_lea.vmem %s5357_s17, 4096  ;;  %p5199_p9 = scmp.lt.s32.totalorder %s5357_s17, %s5357_s17 }
  0x42   : > { %p5192_p4 = scmp.ne.s32.totalorder %s5357_s17, %s5191_s14  ;;  %p5200_p10 = scmp.lt.s32.totalorder %s5191_s14, %s5191_s14 }
  0x44   : > { %p5194_p6 = pnand %p5192_p4, %p5367_p7  ;;  %p5201_p11 = por %p5200_p10, %p5199_p9 }
  0x46   : > { %p5195_p8 = pneg %p5194_p6 }
  0x48   : > { %p5202_p12 = pnand %p5201_p11, %p5195_p8 }
  0x4a   : > { %5205 = shalt.err (!%p5202_p12)
}
  0x4b   : > { %s5227_s16 = smov 256   ;;  %s5228_s18 = smov 16  }
  0x4c   : > { %5031 = dma.hbm_to_vmem [thread:$0]  (!%p5353_p5), %s6296_s12, 4096, %s5357_s17, [#allocation5], %s5227_s16, %s5227_s16, %s5228_s18  }
  0x4d   : > { %423 = sbr.rel (%p5341_p3) target bundleno = 2805 (0xaf5), region = 72 }
  0x54   : > { %5211 = dma.done.wait (%p5032_p2), [#allocation3], 4096  }
  0x55   : > { %5213 = vsyncadd (%p5032_p2), [#allocation3], 4294963200 }
  0x56   : > { %5215 = dma.done.wait (%p5032_p2), [#allocation5], 6144  }
  0x57   : > { %5217 = vsyncadd (%p5032_p2), [#allocation5], 4294961152  ;;  %p475_p7 = scmp.lt.s32.totalorder %s5336_s26, 1  ;;  %v5229_v0 = vmov 0.0   ;;  %v5459_v1 = vld [vmem:[%s6285_s1] sm:$0xff]  ;;  %s5230_s20 = smov 122   ;;  %v486_v8 = vlaneseq }
  0x58   : > { %828 = vmatprep.mubr.f32.mxu0 %v5229_v0  ;;  %641 = vmatprep.mubr.f32.mxu1 %v5229_v0  ;;  %s6304_s21 = smov 15   ;;  %s5232_s22 = smov 1   ;;  %v5477_v4 = vld [vmem:[%s6285_s1 + $0x8] sm:$0xff]  ;;  %v5244_v5 = vmov 0   ;;  %v536_v6 = vld [vmem:[%s6286_s2] sm:$0xff]  ;;  %vm570_vm7 = vcmask 1042432  }
  0x59   : > { %s6342_s26 = smov (!%p475_p7, %s5336_s26), 1  ;;  %750 = vrot.lane.b32.xlu1 %v5459_v1, %s5230_s20  ;;  %s5233_s30 = smov 119   ;;  %5084 = vset.pattern.permute.xlu0 %v5244_v5  ;;  %v537_v7 = vld [vmem:[%s6286_s2 + $0x8] sm:$0xff]  ;;  %v5532_v9 = vand.u32 127, %v486_v8  ;;  %vm565_vm9 = vcmask 23552  }
  0x5a   : > { %s6299_s27 = sshll.u32 %s6342_s26, 3  ;;  %s5234_s14 = smov 127   ;;  %5085 = vset.pattern.permute.xlu1 %v5244_v5 }
  0x5b   : > { %s479_s23 = scalar_lea.vmem %s6284_s0, %s6299_s27  ;;  %s5235_s16 = smov 116   ;;  %v488_v10 = vadd.s32 128, %v5532_v9  ;;  %v489_v12 = vand.u32 255, %v5532_v9  ;;  %vm745_vm4 = vcmp.lt.s32.totalorder %v5532_v9, 15  ;;  %vm849_vm8 = vcmp.lt.s32.totalorder %v5532_v9, 1 }
  0x5c   : > { %v5461_v2 = vld [vmem:[%s479_s23] sm:$0x77]  ;;  %s6302_s18 = smov 113   ;;  %s6310_s29 = smov 16   ;;  %vm1046_vm10 = vcmp.lt.s32.totalorder %v5532_v9, 127  ;;  %vm1150_vm13 = vcmp.lt.s32.totalorder %v5532_v9, 113 }
  0x5d   : > { %741 = vrot.lane.b32.xlu0 %v5461_v2, %s6304_s21  ;;  %v5468_v3 = vcombine.high %v5461_v2, %v5461_v2  ;;  %845 = vrot.lane.b32.xlu1 %v5461_v2, %s5232_s22  ;;  %s5238_s13 = smov 110   ;;  %s5239_s15 = smov 112   ;;  %v490_v11 = vand.u32 255, %v488_v10  ;;  %v493_v15 = vand.u32 15, %v489_v12  ;;  %v5538_v16 = vshra.s32 %v489_v12, 4 }
  0x5e   : > { %s5240_s17 = smov 107   ;;  %s5241_s23 = smov 125   ;;  %vm554_vm14 = vcmp.lt.s32.totalorder %v5532_v9, 16  ;;  %vm1254_vm15 = vcmp.lt.s32.totalorder %v5532_v9, 112 }
  0x5f   : > { %s6307_s25 = smov 17   ;;  %s6300_s19 = smov 111   ;;  %v5536_v13 = vshra.s32 %v490_v11, 4  ;;  %v494_v14 = vand.u32 15, %v490_v11  ;;  %vm495_vm2 = vcmp.ge.s32.totalorder %v5538_v16, 1  ;;  %vm507_vm3 = vcmp.le.s32.totalorder %v493_v15, 14 }
  0x60   : > { %v5549_v19 = vsel %vm495_vm2, 1.0, %v5229_v0  ;;  %v5552_v20 = vsel %vm507_vm3, 1.0, %v5229_v0  ;;  %vm503_vm5 = vcmp.ge.s32.totalorder %v493_v15, 1  ;;  %vm499_vm12 = vcmp.le.s32.totalorder %v5538_v16, 14  ;;  %s5247_s24 = smov 7   ;;  %s5248_s28 = smov 8  }
  0x61   : > { %743 = vrot.lane.b32.xlu0 %v5468_v3, %s6304_s21  ;;  %752 = vrot.lane.b32.xlu1 %v5477_v4, %s5230_s20  ;;  %s6319_s20 = smov 104   ;;  %vm496_vm0 = vcmp.ge.s32.totalorder %v5536_v13, 1  ;;  %vm508_vm1 = vcmp.le.s32.totalorder %v494_v14, 14  ;;  %v5561_v24 = vmul.f32 %v5552_v20, %v5549_v19  ;;  %vm504_vm6 = vcmp.ge.s32.totalorder %v494_v14, 1  ;;  %s6312_s27 = smov 64  }
  0x62   : > { %v5543_v17 = vsel %vm496_vm0, 1.0, %v5229_v0  ;;  %v5546_v18 = vsel %vm508_vm1, 1.0, %v5229_v0  ;;  %v5571_v31 = vsel %vm503_vm5, 1.0, %v5229_v0  ;;  %v5574_v32 = vsel %vm504_vm6, 1.0, %v5229_v0  ;;  %s6309_s21 = smov 32  }
  0x63   : > { %v5557_v23 = vmul.f32 %v5546_v18, %v5543_v17  ;;  %vm500_vm11 = vcmp.le.s32.totalorder %v5536_v13, 14  ;;  %v5613_v52 = vsel %vm499_vm12, 1.0, %v5229_v0  ;;  %vm545_vm0 = vcmp.lt.s32.totalorder %v5532_v9, 17 }
  0x64   : > { %v5607_v48 = vsel %vm500_vm11, 1.0, %v5229_v0  ;;  %v5624_v56 = vmul.f32 %v5571_v31, %v5613_v52  ;;  %vm1358_vm1 = vcmp.lt.s32.totalorder %v5532_v9, 111  ;;  %vm5249_vm2 = vmmov 0  }
  0x65   : > { %847 = vrot.lane.b32.xlu0 %v5468_v3, %s5232_s22  ;;  %856 = vrot.lane.b32.xlu1 %v5477_v4, %s5233_s30  ;;  %v5617_v53 = vmul.f32 %v5574_v32, %v5607_v48  ;;  %vm2558_vm11 = vcmask 64512  }
  0x69   : > { %854 = vrot.lane.b32.xlu0 %v5459_v1, %s5233_s30  ;;  %1042 = vrot.lane.b32.xlu1 %v5461_v2, %s5234_s14 }
  0x6d   : > { %949 = vrot.lane.b32.xlu0 %v5459_v1, %s5235_s16  ;;  %951 = vrot.lane.b32.xlu1 %v5477_v4, %s5235_s16  ;;  %s5250_s16 = smov 9  }
  0x71   : > { %1044 = vrot.lane.b32.xlu0 %v5468_v3, %s5234_s14  ;;  %1146 = vrot.lane.b32.xlu1 %v5461_v2, %s6302_s18 }
  0x75   : > { %1051 = vrot.lane.b32.xlu0 %v5459_v1, %s6302_s18  ;;  %1053 = vrot.lane.b32.xlu1 %v5477_v4, %s6302_s18 }
  0x79   : > { %1148 = vrot.lane.b32.xlu0 %v5468_v3, %s6302_s18  ;;  %550 = vrot.lane.b32.xlu1 %v5461_v2, %s6310_s29  ;;  %s6306_s18 = smov 48  }
  0x7d   : > { %1155 = vrot.lane.b32.xlu0 %v5459_v1, %s5238_s13  ;;  %1250 = vrot.lane.b32.xlu1 %v5461_v2, %s5239_s15 }
  0x81   : > { %552 = vrot.lane.b32.xlu0 %v5468_v3, %s6310_s29  ;;  %1157 = vrot.lane.b32.xlu1 %v5477_v4, %s5238_s13  ;;  %s6314_s13 = smov 80  }
  0x85   : > { %1252 = vrot.lane.b32.xlu0 %v5468_v3, %s5239_s15  ;;  %1259 = vrot.lane.b32.xlu1 %v5459_v1, %s5240_s17 }
  0x89   : > { %561 = vrot.lane.b32.xlu0 %v5459_v1, %s5241_s23  ;;  %543 = vrot.lane.b32.xlu1 %v5468_v3, %s6307_s25 }
  0x8d   : > { %541 = vrot.lane.b32.xlu0 %v5461_v2, %s6307_s25  ;;  %1356 = vrot.lane.b32.xlu1 %v5468_v3, %s6300_s19 }
  0x91   : > { %1354 = vrot.lane.b32.xlu0 %v5461_v2, %s6300_s19  ;;  %1261 = vrot.lane.b32.xlu1 %v5477_v4, %s5240_s17  ;;  %s6317_s17 = smov 96  }
  0x95   : > { %563 = vrot.lane.b32.xlu0 %v5477_v4, %s5241_s23  ;;  %1365 = vrot.lane.b32.xlu1 %v5477_v4, %s6319_s20  ;;  %s6316_s23 = smov 121  }
  0x99   : > { %1363 = vrot.lane.b32.xlu0 %v5459_v1, %s6319_s20  ;;  %1465 = vperm.xlu1 %5085, %v537_v7  }
  0x9d   : > { %1460 = vperm.xlu0 %5084, %v536_v6  }
  0xcb   : > { %v751_v21 = vpop.permute.xlu1 %750 }
  0xcf   : > { %v742_v22 = vpop.permute.xlu0 %741  ;;  %v846_v25 = vpop.permute.xlu1 %845 }
  0xd3   : > { %v744_v26 = vpop.permute.xlu0 %743  ;;  %v753_v33 = vpop.permute.xlu1 %752 }
  0xd4   : > { %v747_v27 = vsel %vm745_vm4, %v744_v26, %v742_v22  ;;  %v746_v28 = vsel %vm745_vm4, %v742_v22, %v744_v26  ;;  %v5668_v22 = vmul.f32 %v5574_v32, %v5543_v17 }
  0xd5   : > { %v749_v29 = vmul.f32 %v746_v28, %v5557_v23  ;;  %v748_v30 = vmul.f32 %v747_v27, %v5561_v24 }
  0xd7   : > { %4399 = vmatprep.subr.msk.mxu0 %vm570_vm7, %v749_v29  ;;  %v848_v34 = vpop.permute.xlu0 %847  ;;  %v857_v39 = vpop.permute.xlu1 %856  ;;  %v5679_v29 = vmul.f32 %v5552_v20, %v5613_v52 }
  0xd8   : > { %v850_v35 = vsel %vm849_vm8, %v846_v25, %v848_v34  ;;  %v851_v36 = vsel %vm849_vm8, %v848_v34, %v846_v25  ;;  %4400 = vmatpush1.msk.msra.mxu0 %vm570_vm7, %v748_v30  ;;  %v5686_v34 = vmul.f32 %v5546_v18, %v5607_v48 }
  0xd9   : > { %v852_v37 = vmul.f32 %v851_v36, %v5571_v31  ;;  %v853_v38 = vmul.f32 %v850_v35, %v5574_v32  ;;  %4401 = vmatmul.mubr.msk.f32.vlgmr.msra.gmra.mrb[0].mxu0 %vm565_vm9, %v751_v21  ;;  %v5664_v21 = vmul.f32 %v5571_v31, %v5549_v19 }
  0xda   : > { %834 = vmatprep.mubr.f32.mxu0 %v5229_v0 }
  0xdb   : > { %4403 = vmatprep.subr.msk.mxu0 %vm570_vm7, %v853_v38  ;;  %v855_v40 = vpop.permute.xlu0 %854  ;;  %v1043_v41 = vpop.permute.xlu1 %1042 }
  0xdc   : > { %4404 = vmatpush1.msk.msra.mxu0 %vm570_vm7, %v852_v37 }
  0xdd   : > { %4402 = vmatmul.mubr.msk.f32.gmra.mrb[2].mxu0 %vm565_vm9, %v753_v33  ;;  %4407 = vmatprep.subr.msk.mxu0 %vm570_vm7, %v5468_v3 }
  0xde   : > { %932 = vmatprep.mubr.f32.mxu0 %v5229_v0 }
  0xdf   : > { %v950_v42 = vpop.permute.xlu0 %949  ;;  %v952_v43 = vpop.permute.xlu1 %951 }
  0xe1   : > { %4405 = vmatmul.mubr.msk.f32.vlgmr.msra.gmra.mrb[0].mxu0 %vm565_vm9, %v855_v40 }
  0xe2   : > { %938 = vmatprep.mubr.f32.mxu0 %v5229_v0  ;;  %4408 = vmatpush1.msk.msra.mxu0 %vm570_vm7, %v5461_v2 }
  0xe3   : > { %v1045_v44 = vpop.permute.xlu0 %1044  ;;  %v1147_v49 = vpop.permute.xlu1 %1146 }
  0xe4   : > { %v1048_v45 = vsel %vm1046_vm10, %v1045_v44, %v1043_v41  ;;  %v1047_v46 = vsel %vm1046_vm10, %v1043_v41, %v1045_v44 }
  0xe5   : > { %v1050_v47 = vmul.f32 %v1048_v45, %v5546_v18  ;;  %4406 = vmatmul.mubr.msk.f32.gmra.mrb[2].mxu0 %vm565_vm9, %v857_v39  ;;  %v1049_v51 = vmul.f32 %v1047_v46, %v5552_v20  ;;  %v1492_v45 = vld [vmem:[#allocation2 + $0x80] sm:$0xff]  ;;  %v1493_v46 = vld [vmem:[#allocation2 + $0x88] sm:$0xff] }
  0xe6   : > { %1025 = vmatprep.mubr.f32.mxu0 %v5229_v0 }
  0xe7   : > { %4411 = vmatprep.subr.msk.mxu0 %vm570_vm7, %v1050_v47  ;;  %v1052_v50 = vpop.permute.xlu0 %1051  ;;  %v1054_v54 = vpop.permute.xlu1 %1053  ;;  %v1476_v47 = vld [vmem:[#allocation2] sm:$0xff] }
  0xe9   : > { %4409 = vmatmul.mubr.msk.f32.vlgmr.msra.gmra.mrb[0].mxu0 %vm565_vm9, %v950_v42 }
  0xea   : > { %4412 = vmatpush1.msk.msra.mxu0 %vm570_vm7, %v1049_v51  ;;  %1031 = vmatprep.mubr.f32.mxu0 %v5229_v0  ;;  %v1494_v51 = vld [vmem:[#allocation2 + $0x90] sm:$0xff] }
  0xeb   : > { %v1149_v55 = vpop.permute.xlu0 %1148  ;;  %v551_v60 = vpop.permute.xlu1 %550 }
  0xec   : > { %v1152_v57 = vsel %vm1150_vm13, %v1149_v55, %v1147_v49  ;;  %v1151_v58 = vsel %vm1150_vm13, %v1147_v49, %v1149_v55  ;;  %v4771_v49 = vpack.c.bf16 %v1493_v46, %v1492_v45 }
  0xed   : > { %v1154_v59 = vmul.f32 %v1152_v57, %v5617_v53  ;;  %4410 = vmatmul.mubr.msk.f32.gmra.mrb[2].mxu0 %vm565_vm9, %v952_v43  ;;  %v1153_v62 = vmul.f32 %v1151_v58, %v5624_v56  ;;  %v1478_v57 = vld [vmem:[#allocation2 + $0x10] sm:$0xff]  ;;  %v1479_v58 = vld [vmem:[#allocation2 + $0x18] sm:$0xff] }
  0xee   : > { %1129 = vmatprep.mubr.f32.mxu0 %v5229_v0 }
  0xef   : > { %4415 = vmatprep.subr.msk.mxu0 %vm570_vm7, %v1154_v59  ;;  %v1156_v61 = vpop.permute.xlu0 %1155  ;;  %v1251_v63 = vpop.permute.xlu1 %1250  ;;  %v1496_v59 = vld [vmem:[#allocation2 + $0xa0] sm:$0xff] }
  0xf1   : > { %4413 = vmatmul.mubr.msk.f32.vlgmr.msra.gmra.mrb[0].mxu0 %vm565_vm9, %v1052_v50  ;;  %v1477_v50 = vld [vmem:[#allocation2 + $0x8] sm:$0xff] }
  0xf2   : > { %4416 = vmatpush1.msk.msra.mxu0 %vm570_vm7, %v1153_v62  ;;  %1135 = vmatprep.mubr.f32.mxu0 %v5229_v0  ;;  %v1480_v62 = vld [vmem:[#allocation2 + $0x20] sm:$0xff] }
  0xf3   : > { %v553_v2 = vpop.permute.xlu0 %552  ;;  %v1158_v8 = vpop.permute.xlu1 %1157 }
  0xf4   : > { %v556_v3 = vsel %vm554_vm14, %v553_v2, %v551_v60  ;;  %v555_v5 = vsel %vm554_vm14, %v551_v60, %v553_v2  ;;  %v1497_v60 = vld [vmem:[#allocation2 + $0xa8] sm:$0xff]  ;;  %v1498_v2 = vld [vmem:[#allocation2 + $0xb0] sm:$0xff] }
  0xf5   : > { %4414 = vmatmul.mubr.msk.f32.gmra.mrb[2].mxu0 %vm565_vm9, %v1054_v54  ;;  %v558_v6 = vmul.f32 %v555_v5, %v5543_v17  ;;  %v557_v7 = vmul.f32 %v556_v3, %v5549_v19  ;;  %v1495_v54 = vld [vmem:[#allocation2 + $0x98] sm:$0xff] }
  0xf6   : > { %1233 = vmatprep.mubr.f32.mxu0 %v5229_v0  ;;  %v4775_v55 = vpack.c.bf16 %v1495_v54, %v1494_v51  ;;  %v1499_v3 = vld [vmem:[#allocation2 + $0xb8] sm:$0xff]  ;;  %v1506_v51 = vld [vmem:[#allocation2 + $0xf0] sm:$0xff] }
  0xf7   : > { %4391 = vmatprep.subr.msk.mxu1 %vm570_vm7, %v558_v6  ;;  %v1253_v10 = vpop.permute.xlu0 %1252  ;;  %v1260_v15 = vpop.permute.xlu1 %1259  ;;  %v4783_v6 = vpack.c.bf16 %v1499_v3, %v1498_v2  ;;  %v1507_v54 = vld [vmem:[#allocation2 + $0xf8] sm:$0xff] }
  0xf8   : > { %v1255_v11 = vsel %vm1254_vm15, %v1251_v63, %v1253_v10  ;;  %v1256_v12 = vsel %vm1254_vm15, %v1253_v10, %v1251_v63  ;;  %4392 = vmatpush1.msk.msra.mxu1 %vm570_vm7, %v557_v7  ;;  %v1481_v63 = vld [vmem:[#allocation2 + $0x28] sm:$0xff]  ;;  %v1482_v7 = vld [vmem:[#allocation2 + $0x30] sm:$0xff]  ;;  %v1500_v10 = vld [vmem:[#allocation2 + $0xc0] sm:$0xff] }
  0xf9   : > { %v1257_v13 = vmul.f32 %v1255_v11, %v5613_v52  ;;  %v1258_v14 = vmul.f32 %v1256_v12, %v5607_v48  ;;  %4417 = vmatmul.mubr.msk.f32.vlgmr.msra.gmra.mrb[0].mxu0 %vm565_vm9, %v1156_v61  ;;  %v4777_v61 = vpack.c.bf16 %v1479_v58, %v1478_v57  ;;  %v4781_v5 = vpack.c.bf16 %v1481_v63, %v1480_v62  ;;  %v1501_v11 = vld [vmem:[#allocation2 + $0xc8] sm:$0xff] }
  0xfa   : > { %1239 = vmatprep.mubr.f32.mxu0 %v5229_v0  ;;  %v4799_v58 = vpack.c.bf16 %v1507_v54, %v1506_v51 }
  0xfb   : > { %4419 = vmatprep.subr.msk.mxu0 %vm570_vm7, %v1258_v14  ;;  %v562_v16 = vpop.permute.xlu0 %561  ;;  %v544_v25 = vpop.permute.xlu1 %543  ;;  %v1484_v14 = vld [vmem:[#allocation2 + $0x40] sm:$0xff] }
  0xfc   : > { %4393 = vmatmul.mubr.msk.f32.vlgmr.msra.gmra.mrb[0].mxu1 %vm565_vm9, %v562_v16  ;;  %4420 = vmatpush1.msk.msra.mxu0 %vm570_vm7, %v1257_v13  ;;  %v4787_v13 = vpack.c.bf16 %v1501_v11, %v1500_v10 }
  0xfd   : > { %4418 = vmatmul.mubr.msk.f32.gmra.mrb[2].mxu0 %vm565_vm9, %v1158_v8  ;;  %647 = vmatprep.mubr.f32.mxu1 %v5229_v0  ;;  %v1483_v8 = vld [vmem:[#allocation2 + $0x38] sm:$0xff] }
  0xfe   : > { %1337 = vmatprep.mubr.f32.mxu0 %v5229_v0  ;;  %v4785_v12 = vpack.c.bf16 %v1483_v8, %v1482_v7 }
  0xff   : > { %v542_v26 = vpop.permute.xlu0 %541  ;;  %v1357_v35 = vpop.permute.xlu1 %1356 }
 0x100   : > { %v546_v27 = vsel %vm545_vm0, %v542_v26, %v544_v25  ;;  %v547_v28 = vsel %vm545_vm0, %v544_v25, %v542_v26  ;;  %v1502_v25 = vld [vmem:[#allocation2 + $0xd0] sm:$0xff]  ;;  %v1503_v26 = vld [vmem:[#allocation2 + $0xd8] sm:$0xff] }
 0x101   : > { %v548_v30 = vmul.f32 %v547_v28, %v5664_v21  ;;  %v549_v33 = vmul.f32 %v546_v27, %v5668_v22  ;;  %4421 = vmatmul.mubr.msk.f32.vlgmr.msra.gmra.mrb[0].mxu0 %vm565_vm9, %v1260_v15  ;;  %v1485_v15 = vld [vmem:[#allocation2 + $0x48] sm:$0xff]  ;;  %v4791_v27 = vpack.c.bf16 %v1503_v26, %v1502_v25  ;;  %v1486_v28 = vld [vmem:[#allocation2 + $0x50] sm:$0xff] }
 0x102   : > { %1343 = vmatprep.mubr.f32.mxu0 %v5229_v0  ;;  %v4789_v16 = vpack.c.bf16 %v1485_v15, %v1484_v14 }
 0x103   : > { %4395 = vmatprep.subr.msk.mxu1 %vm570_vm7, %v549_v33  ;;  %v1355_v36 = vpop.permute.xlu0 %1354  ;;  %v1262_v41 = vpop.permute.xlu1 %1261 }
 0x104   : > { %v1359_v37 = vsel %vm1358_vm1, %v1355_v36, %v1357_v35  ;;  %v1360_v38 = vsel %vm1358_vm1, %v1357_v35, %v1355_v36  ;;  %4396 = vmatpush1.msk.msra.mxu1 %vm570_vm7, %v548_v30  ;;  %v1487_v30 = vld [vmem:[#allocation2 + $0x58] sm:$0xff]  ;;  %v1504_v36 = vld [vmem:[#allocation2 + $0xe0] sm:$0xff] }
 0x105   : > { %v1361_v39 = vmul.f32 %v1359_v37, %v5679_v29  ;;  %v1362_v40 = vmul.f32 %v1360_v38, %v5686_v34  ;;  %4422 = vmatmul.mubr.msk.f32.gmra.mrb[2].mxu0 %vm565_vm9, %v1262_v41  ;;  %4772 = vmatprep.subr.bf16.mxu1 %v4771_v49  ;;  %v4793_v33 = vpack.c.bf16 %v1487_v30, %v1486_v28  ;;  %v1505_v37 = vld [vmem:[#allocation2 + $0xe8] sm:$0xff]  ;;  %v1488_v41 = vld [vmem:[#allocation2 + $0x60] sm:$0xff] }
 0x106   : > { %1441 = vmatprep.mubr.f32.mxu0 %v5229_v0 }
 0x107   : > { %4423 = vmatprep.subr.msk.mxu0 %vm570_vm7, %v1362_v40  ;;  %v564_v42 = vpop.permute.xlu0 %563  ;;  %v1366_v44 = vpop.permute.xlu1 %1365  ;;  %v4795_v40 = vpack.c.bf16 %v1505_v37, %v1504_v36 }
 0x108   : > { %4394 = vmatmul.mubr.msk.f32.gmra.mrb[2].mxu1 %vm565_vm9, %v564_v42  ;;  %4424 = vmatpush1.msk.msra.mxu0 %vm570_vm7, %v1361_v39  ;;  %v1489_v42 = vld [vmem:[#allocation2 + $0x68] sm:$0xff]  ;;  %vm1649_vm7 = vcmask 130048  }
 0x109   : > { %728 = vmatprep.mubr.f32.mxu1 %v5229_v0  ;;  %v4797_v46 = vpack.c.bf16 %v1489_v42, %v1488_v41 }
 0x10b   : > { %v1364_v43 = vpop.permute.xlu0 %1363 }
 0x10c   : > { %4397 = vmatmul.mubr.msk.f32.vlgmr.msra.gmra.mrb[0].mxu1 %vm565_vm9, %v5459_v1  ;;  %4425 = vmatmul.mubr.msk.f32.vlgmr.msra.gmra.mrb[0].mxu0 %vm565_vm9, %v1364_v43  ;;  %v4773_v1 = vpack.c.bf16 %v1477_v50, %v1476_v47 }
 0x10d   : > { %734 = vmatprep.mubr.f32.mxu1 %v5229_v0  ;;  %1447 = vmatprep.mubr.f32.mxu0 %v5229_v0 }
 0x10e   : > { %4774 = vmatpush3.bf16.msra.mxu1 %v4773_v1 }
 0x10f   : > { %4776 = vmatprep.subr.bf16.mxu1 %v4775_v55 }
 0x110   : > { %4398 = vmatmul.mubr.msk.f32.gmra.mrb[2].mxu1 %vm565_vm9, %v5477_v4  ;;  %4426 = vmatmul.mubr.msk.f32.gmra.mrb[2].mxu0 %vm565_vm9, %v1366_v44  ;;  %v4779_v4 = vpack.c.bf16 %v1497_v60, %v1496_v59  ;;  %v1490_v59 = vld [vmem:[#allocation2 + $0x70] sm:$0xff]  ;;  %v1491_v60 = vld [vmem:[#allocation2 + $0x78] sm:$0xff] }
 0x111   : > { %v4801_v2 = vpack.c.bf16 %v1491_v60, %v1490_v59  ;;  %4688 = vmatprep.mubr.msk.f32.mxu0 %vm5249_vm2, %v5229_v0 }
 0x112   : > { %4778 = vmatpush3.bf16.msra.mxu1 %v4777_v61 }
 0x113   : > { %4780 = vmatprep.subr.bf16.mxu1 %v4779_v4 }
 0x116   : > { %4782 = vmatpush3.bf16.msra.mxu1 %v4781_v5 }
 0x117   : > { %4784 = vmatprep.subr.bf16.mxu1 %v4783_v6 }
 0x118   : > { %v1466_v50 = vpop.permute.xlu1 %1465 }
 0x11a   : > { %4786 = vmatpush3.bf16.msra.mxu1 %v4785_v12 }
 0x11b   : > { %4788 = vmatprep.subr.bf16.mxu1 %v4787_v13  ;;  %v5721_v13 = vld [vmem:[%s6287_s3] sm:$0xff] }
 0x11c   : > { %v1461_v35 = vpop.permute.xlu0 %1460 }
 0x11e   : > { %4790 = vmatpush3.bf16.msra.mxu1 %v4789_v16 }
 0x11f   : > { %4792 = vmatprep.subr.bf16.mxu1 %v4791_v27 }
 0x122   : > { %4794 = vmatpush3.bf16.msra.mxu1 %v4793_v33 }
 0x123   : > { %4796 = vmatprep.subr.bf16.mxu1 %v4795_v40 }
 0x126   : > { %4798 = vmatpush3.bf16.msra.mxu1 %v4797_v46 }
 0x127   : > { %4800 = vmatprep.subr.bf16.mxu1 %v4799_v58 }
 0x12a   : > { %4802 = vmatpush3.bf16.msra.mxu1 %v4801_v2 }
 0x1df   : > { %v730_v38 = vpop.f32.mrb[0].mxu1  ;;  %v1443_v39 = vpop.f32.mrb[0].mxu0 }
 0x1e0   : > { %v4946_v43 = vadd.f32 %v1443_v39, %v730_v38  ;;  %v732_v44 = vpop.f32.mrb[1].mxu1  ;;  %v1445_v45 = vpop.f32.mrb[1].mxu0 }
 0x1e1   : > { %v4947_v47 = vadd.f32 %v1445_v45, %v732_v44 }
 0x1e2   : > { %v1468_v49 = vadd.f32 %v4946_v43, %v1461_v35 }
 0x1e3   : > { %v1469_v1 = vadd.f32 %v4947_v47, %v1461_v35  ;;  %v736_v55 = vpop.f32.mrb[2].mxu1  ;;  %v1449_v57 = vpop.f32.mrb[2].mxu0 }
 0x1e4   : > { %v1472_v61 = vmax.f32 %v1468_v49, 0.0  ;;  %v4948_v4 = vadd.f32 %v1449_v57, %v736_v55  ;;  %v738_v62 = vpop.f32.mrb[3].mxu1  ;;  %v1451_v63 = vpop.f32.mrb[3].mxu0 }
 0x1e5   : > { %v1473_v3 = vmax.f32 %v1469_v1, 0.0  ;;  %v4949_v5 = vadd.f32 %v1451_v63, %v738_v62 }
 0x1e6   : > { %v1470_v6 = vadd.f32 %v4948_v4, %v1466_v50 }
 0x1e7   : > { %v1471_v7 = vadd.f32 %v4949_v5, %v1466_v50  ;;  %v5091_v8 = vpack.i.bf16 %v1473_v3, %v1472_v61 }
 0x1e8   : > { %v1474_v10 = vmax.f32 %v1470_v6, 0.0 }
 0x1e9   : > { %v1475_v11 = vmax.f32 %v1471_v7, 0.0  ;;  %5092 = vrot.lane.b32.xlu0 %v5091_v8, %s5239_s15  ;;  %5087 = vrot.lane.b32.xlu1 %v5091_v8, %s5234_s14 }
 0x1eb   : > { %v5101_v12 = vpack.i.bf16 %v1475_v11, %v1474_v10 }
 0x1ed   : > { %5102 = vrot.lane.b32.xlu0 %v5101_v12, %s5234_s14  ;;  %5097 = vrot.lane.b32.xlu1 %v5091_v8, %s6300_s19 }
 0x1f1   : > { %5112 = vrot.lane.b32.xlu0 %v5101_v12, %s6300_s19  ;;  %5107 = vrot.lane.b32.xlu1 %v5101_v12, %s5239_s15  ;;  %s5255_s19 = smov 120  }
 0x1f5   : > { %1647 = vrot.lane.b32.xlu1 %v5721_v13, %s5239_s15 }
 0x25b   : > { %v5093_v14 = vpop.permute.xlu0 %5092  ;;  %v5088_v15 = vpop.permute.xlu1 %5087 }
 0x25c   : > { %v5090_v16 = vunpack.i.h.bf16 %v5088_v15  ;;  %v5089_v25 = vunpack.i.l.bf16 %v5088_v15  ;;  %v5095_v26 = vunpack.i.h.bf16 %v5093_v14  ;;  %v5094_v27 = vunpack.i.l.bf16 %v5093_v14 }
 0x25e   : > { %v1516_v28 = vsel %vm1046_vm10, %v5089_v25, %v5090_v16  ;;  %v1518_v35 = vsel %vm1046_vm10, %v5090_v16, %v5089_v25  ;;  %v1532_v40 = vsel %vm1254_vm15, %v5094_v27, %v5095_v26  ;;  %v1534_v41 = vsel %vm1254_vm15, %v5095_v26, %v5094_v27  ;;  %v1633_v27 = vld [vmem:[%s6288_s4] sm:$0xff] }
 0x25f   : > { %v5103_v30 = vpop.permute.xlu0 %5102  ;;  %v5098_v33 = vpop.permute.xlu1 %5097  ;;  %v1520_v42 = vmax.f32 %v1472_v61, %v1516_v28  ;;  %v1521_v45 = vmax.f32 %v1473_v3, %v1518_v35  ;;  %v5246_v16 = vmov 0.0|0.0  }
 0x260   : > { %v5105_v36 = vunpack.i.h.bf16 %v5103_v30  ;;  %v5104_v37 = vunpack.i.l.bf16 %v5103_v30  ;;  %v5100_v38 = vunpack.i.h.bf16 %v5098_v33  ;;  %v5099_v39 = vunpack.i.l.bf16 %v5098_v33  ;;  %4803 = vmatprep.subr.bf16.mxu1 %v5246_v16  ;;  %4830 = vmatprep.subr.bf16.mxu0 %v5246_v16 }
 0x261   : > { %v519_v30 = vand.u32 63, %v5532_v9 }
 0x262   : > { %v1544_v43 = vsel %vm1358_vm1, %v5099_v39, %v5100_v38  ;;  %v1546_v44 = vsel %vm1358_vm1, %v5100_v38, %v5099_v39  ;;  %v1517_v46 = vsel %vm1046_vm10, %v5104_v37, %v5105_v36  ;;  %v1519_v47 = vsel %vm1046_vm10, %v5105_v36, %v5104_v37 }
 0x263   : > { %v1548_v49 = vmax.f32 %v1532_v40, %v1544_v43  ;;  %v5113_v50 = vpop.permute.xlu0 %5112  ;;  %v5108_v51 = vpop.permute.xlu1 %5107  ;;  %v1549_v54 = vmax.f32 %v1534_v41, %v1546_v44  ;;  %v1523_v2 = vmax.f32 %v1475_v11, %v1519_v47  ;;  %v1522_v5 = vmax.f32 %v1474_v10, %v1517_v46 }
 0x264   : > { %v5115_v1 = vunpack.i.h.bf16 %v5113_v50  ;;  %v5114_v55 = vunpack.i.l.bf16 %v5113_v50  ;;  %v5110_v57 = vunpack.i.h.bf16 %v5108_v51  ;;  %v5109_v58 = vunpack.i.l.bf16 %v5108_v51 }
 0x265   : > { %v1552_v59 = vmax.f32 %v1520_v42, %v1548_v49  ;;  %v1553_v60 = vmax.f32 %v1521_v45, %v1549_v54  ;;  %v520_v36 = vshra.s32 %v519_v30, 3  ;;  %v521_v37 = vand.u32 7, %v519_v30 }
 0x266   : > { %v1545_v61 = vsel %vm1358_vm1, %v5114_v55, %v5115_v1  ;;  %v1547_v4 = vsel %vm1358_vm1, %v5115_v1, %v5114_v55  ;;  %v1533_v62 = vsel %vm1254_vm15, %v5109_v58, %v5110_v57  ;;  %v1535_v63 = vsel %vm1254_vm15, %v5110_v57, %v5109_v58 }
 0x267   : > { %1620 = vmatprep.mubr.f32.mxu1 %v1553_v60  ;;  %v1551_v3 = vmax.f32 %v1535_v63, %v1547_v4  ;;  %v1550_v6 = vmax.f32 %v1533_v62, %v1545_v61  ;;  %v1648_v28 = vpop.permute.xlu1 %1647  ;;  %vm526_vm3 = vcmp.ge.s32.totalorder %v521_v37, 1  ;;  %vm522_vm5 = vcmp.ge.s32.totalorder %v520_v36, 1 }
 0x268   : > { %1621 = vmatmul.mubr.f32.vlgmr.msra.gmra.mrb[4].mxu1 %v1552_v59  ;;  %v5810_v40 = vsel %vm526_vm3, 1.0, %v5229_v0  ;;  %vm528_vm6 = vcmp.le.s32.totalorder %v521_v37, 6  ;;  %v5813_v41 = vsel %vm522_vm5, 1.0, %v5229_v0  ;;  %vm524_vm9 = vcmp.le.s32.totalorder %v520_v36, 6 }
 0x269   : > { %v1555_v7 = vmax.f32 %v1523_v2, %v1551_v3  ;;  %v1554_v8 = vmax.f32 %v1522_v5, %v1550_v6  ;;  %v5818_v45 = vmul.f32 %v5810_v40, %v5813_v41  ;;  %v5822_v47 = vsel %vm528_vm6, 1.0, %v5229_v0 }
 0x26a   : > { %v5826_v54 = vmul.f32 %v5822_v47, %v5813_v41 }
 0x26b   : > { %1625 = vmatprep.mubr.f32.mxu1 %v1555_v7 }
 0x26c   : > { %1626 = vmatmul.mubr.f32.gmra.mrb[6].mxu1 %v1554_v8 }
 0x26d   : > { %4597 = vmatprep.mubr.msk.f32.mxu1 %vm5249_vm2, %v5229_v0 }
 0x33b   : > { %v4499_v12 = vpop.f32.mrb[4].mxu1 }
 0x33c   : > { %v4500_v14 = vpop.f32.mrb[5].mxu1 }
 0x33d   : > { %v5749_v15 = vadd.f32 %v4500_v14, %v4499_v12 }
 0x33f   : > { %v4502_v25 = vpop.f32.mrb[6].mxu1  ;;  %1794 = vrot.lane.b32.xlu0 %v5749_v15, %s5247_s24  ;;  %1640 = vrot.lane.b32.xlu1 %v5749_v15, %s5248_s28 }
 0x340   : > { %v4503_v10 = vpop.f32.mrb[7].mxu1 }
 0x341   : > { %v5757_v11 = vadd.f32 %v4503_v10, %v4502_v25 }
 0x343   : > { %1875 = vrot.lane.b32.xlu0 %v5749_v15, %s5232_s22  ;;  %1634 = vrot.lane.b32.xlu1 %v5749_v15, %s5250_s16  ;;  %v4816_v26 = vpack.c.bf16 %v5757_v11, %v5749_v15 }
 0x347   : > { %1642 = vrot.lane.b32.xlu0 %v5757_v11, %s5248_s28  ;;  %1881 = vrot.lane.b32.xlu1 %v5721_v13, %s6314_s13  ;;  %s6330_s13 = smov 64  }
 0x34b   : > { %1636 = vrot.lane.b32.xlu0 %v5757_v11, %s5250_s16  ;;  %1796 = vrot.lane.b32.xlu1 %v5757_v11, %s5247_s24 }
 0x34f   : > { %1800 = vrot.lane.b32.xlu0 %v5721_v13, %s6317_s17  ;;  %1877 = vrot.lane.b32.xlu1 %v5757_v11, %s5232_s22 }
 0x353   : > { %2031 = vrot.lane.b32.xlu0 %v5749_v15, %s5234_s14  ;;  %2112 = vrot.lane.b32.xlu1 %v5749_v15, %s6316_s23 }
 0x357   : > { %1956 = vrot.lane.b32.xlu0 %v5721_v13, %s6312_s27  ;;  %2033 = vrot.lane.b32.xlu1 %v5757_v11, %s5234_s14  ;;  %s5259_s27 = smov 72  }
 0x35b   : > { %2193 = vrot.lane.b32.xlu0 %v5749_v15, %s5255_s19  ;;  %2037 = vrot.lane.b32.xlu1 %v5721_v13, %s6306_s18 }
 0x35f   : > { %2114 = vrot.lane.b32.xlu0 %v5757_v11, %s6316_s23  ;;  %2195 = vrot.lane.b32.xlu1 %v5757_v11, %s5255_s19  ;;  %s6339_s23 = sld [smem:[#allocation10_spill]] }
 0x363   : > { %2118 = vrot.lane.b32.xlu0 %v5721_v13, %s6309_s21  ;;  %2274 = vrot.lane.b32.xlu1 %v5749_v15, %s5233_s30  ;;  %s5258_s21 = smov 88  }
 0x367   : > { %2276 = vrot.lane.b32.xlu0 %v5757_v11, %s5233_s30  ;;  %2199 = vrot.lane.b32.xlu1 %v5721_v13, %s6310_s29  ;;  %s6328_s29 = smov 121  }
 0x36b   : > { %2356 = vperm.xlu0 %5084, %v1633_v27  }
 0x3b1   : > { %v1795_v33 = vpop.permute.xlu0 %1794  ;;  %v1641_v35 = vpop.permute.xlu1 %1640 }
 0x3b2   : > { %v1644_v44 = vmul.f32 %v1641_v35, %v5813_v41  ;;  %v1798_v61 = vmul.f32 %v1795_v33, %v5826_v54 }
 0x3b5   : > { %v1876_v38 = vpop.permute.xlu0 %1875  ;;  %v1635_v39 = vpop.permute.xlu1 %1634 }
 0x3b6   : > { %v1638_v1 = vmul.f32 %v1635_v39, %v5818_v45  ;;  %v1879_v3 = vmul.f32 %v1876_v38, %v5810_v40 }
 0x3b9   : > { %v1643_v42 = vpop.permute.xlu0 %1642  ;;  %v1882_v43 = vpop.permute.xlu1 %1881 }
 0x3ba   : > { %v1645_v46 = vmul.f32 %v1643_v42, %v5813_v41 }
 0x3bc   : > { %v4804_v49 = vpack.c.bf16 %v1645_v46, %v1644_v44 }
 0x3bd   : > { %v1637_v50 = vpop.permute.xlu0 %1636  ;;  %v1797_v51 = vpop.permute.xlu1 %1796 }
 0x3be   : > { %v1639_v55 = vmul.f32 %v1637_v50, %v5818_v45  ;;  %4805 = vmatpush3.bf16.msra.mxu1 %v4804_v49  ;;  %v1799_v58 = vmul.f32 %v1797_v51, %v5826_v54  ;;  %v1632_v50 = vld [vmem:[%s6287_s3 + $0x8] sm:$0xff]  ;;  %v2361_v51 = vld [vmem:[%s6294_s10] sm:$0xff] }
 0x3bf   : > { %4806 = vmatprep.subr.bf16.mxu1 %v5246_v16 }
 0x3c0   : > { %v4807_v57 = vpack.c.bf16 %v1639_v55, %v1638_v1  ;;  %v4810_v4 = vpack.c.bf16 %v1799_v58, %v1798_v61  ;;  %v2362_v1 = vld [vmem:[%s6294_s10 + $0x8] sm:$0xff]  ;;  %v2363_v55 = vld [vmem:[%s6294_s10 + $0x10] sm:$0xff]  ;;  %v2364_v58 = vld [vmem:[%s6294_s10 + $0x18] sm:$0xff] }
 0x3c1   : > { %v1801_v59 = vpop.permute.xlu0 %1800  ;;  %4598 = vmatmul.mubr.msk.f32.vlgmr.msra.gmra.mrb[8].mxu1 %vm1649_vm7, %v1648_v28  ;;  %v1878_v60 = vpop.permute.xlu1 %1877  ;;  %v2366_v61 = vld [vmem:[%s6294_s10 + $0x28] sm:$0xff] }
 0x3c2   : > { %4808 = vmatpush3.bf16.msra.mxu1 %v4807_v57  ;;  %4604 = vmatprep.mubr.msk.f32.mxu1 %vm5249_vm2, %v5229_v0  ;;  %v1880_v62 = vmul.f32 %v1878_v60, %v5810_v40  ;;  %v4831_v57 = vpack.c.bf16 %v2362_v1, %v2361_v51  ;;  %v2365_v60 = vld [vmem:[%s6294_s10 + $0x20] sm:$0xff] }
 0x3c3   : > { %4809 = vmatprep.subr.bf16.mxu1 %v5246_v16  ;;  %v2373_v1 = vld [vmem:[%s6294_s10 + $0x60] sm:$0xff] }
 0x3c4   : > { %v4813_v5 = vpack.c.bf16 %v1880_v62, %v1879_v3  ;;  %4832 = vmatpush3.bf16.msra.mxu0 %v4831_v57  ;;  %v2367_v62 = vld [vmem:[%s6294_s10 + $0x30] sm:$0xff]  ;;  %v2369_v3 = vld [vmem:[%s6294_s10 + $0x40] sm:$0xff] }
 0x3c5   : > { %v2032_v63 = vpop.permute.xlu0 %2031  ;;  %4605 = vmatmul.mubr.msk.f32.vlgmr.msra.gmra.mrb[10].mxu1 %vm1649_vm7, %v5721_v13  ;;  %v2113_v2 = vpop.permute.xlu1 %2112  ;;  %v5848_v13 = vsel %vm524_vm9, 1.0, %v5229_v0  ;;  %4833 = vmatprep.subr.bf16.mxu0 %v5246_v16 }
 0x3c6   : > { %4811 = vmatpush3.bf16.msra.mxu1 %v4810_v4  ;;  %4611 = vmatprep.mubr.msk.f32.mxu1 %vm5249_vm2, %v5229_v0  ;;  %v2035_v25 = vmul.f32 %v2032_v63, %v5822_v47  ;;  %v5856_v10 = vmul.f32 %v5810_v40, %v5848_v13  ;;  %v5875_v37 = vmul.f32 %v5822_v47, %v5848_v13  ;;  %v2368_v63 = vld [vmem:[%s6294_s10 + $0x38] sm:$0xff] }
 0x3c7   : > { %4812 = vmatprep.subr.bf16.mxu1 %v5246_v16  ;;  %v4837_v4 = vpack.c.bf16 %v2366_v61, %v2365_v60  ;;  %v2375_v61 = vld [vmem:[%s6294_s10 + $0x70] sm:$0xff] }
 0x3c8   : > { %v2116_v33 = vmul.f32 %v2113_v2, %v5856_v10  ;;  %v4840_v2 = vpack.c.bf16 %v2368_v63, %v2367_v62 }
 0x3c9   : > { %v1957_v6 = vpop.permute.xlu0 %1956  ;;  %4612 = vmatmul.mubr.msk.f32.vlgmr.msra.gmra.mrb[12].mxu1 %vm1649_vm7, %v1801_v59  ;;  %v2034_v7 = vpop.permute.xlu1 %2033  ;;  %v4834_v59 = vpack.c.bf16 %v2364_v58, %v2363_v55  ;;  %v2374_v55 = vld [vmem:[%s6294_s10 + $0x68] sm:$0xff] }
 0x3ca   : > { %4814 = vmatpush3.bf16.msra.mxu1 %v4813_v5  ;;  %4618 = vmatprep.mubr.msk.f32.mxu1 %vm5249_vm2, %v5229_v0  ;;  %v2036_v8 = vmul.f32 %v2034_v7, %v5822_v47  ;;  %v2370_v5 = vld [vmem:[%s6294_s10 + $0x48] sm:$0xff]  ;;  %v2371_v7 = vld [vmem:[%s6294_s10 + $0x50] sm:$0xff]  ;;  %v4849_v57 = vpack.c.bf16 %v2374_v55, %v2373_v1  ;;  %v2471_v1 = vld [vmem:[#allocation4 + $0x78] sm:$0xff] }
 0x3cb   : > { %4815 = vmatprep.subr.bf16.mxu1 %v5246_v16  ;;  %4835 = vmatpush3.bf16.msra.mxu0 %v4834_v59 }
 0x3cc   : > { %v4819_v27 = vpack.c.bf16 %v2036_v8, %v2035_v25  ;;  %4836 = vmatprep.subr.bf16.mxu0 %v5246_v16  ;;  %v2372_v8 = vld [vmem:[%s6294_s10 + $0x58] sm:$0xff] }
 0x3cd   : > { %v2194_v12 = vpop.permute.xlu0 %2193  ;;  %4619 = vmatmul.mubr.msk.f32.vlgmr.msra.gmra.mrb[14].mxu1 %vm1649_vm7, %v1882_v43  ;;  %v2038_v14 = vpop.permute.xlu1 %2037 }
 0x3ce   : > { %4817 = vmatpush3.bf16.msra.mxu1 %v4816_v26  ;;  %4625 = vmatprep.mubr.msk.f32.mxu1 %vm5249_vm2, %v5229_v0  ;;  %v2197_v36 = vmul.f32 %v2194_v12, %v5848_v13  ;;  %v4846_v12 = vpack.c.bf16 %v2372_v8, %v2371_v7  ;;  %v2457_v7 = vld [vmem:[#allocation4 + $0x8] sm:$0xff]  ;;  %v2458_v8 = vld [vmem:[#allocation4 + $0x10] sm:$0xff] }
 0x3cf   : > { %4818 = vmatprep.subr.bf16.mxu1 %v5246_v16  ;;  %4838 = vmatpush3.bf16.msra.mxu0 %v4837_v4  ;;  %v2376_v4 = vld [vmem:[%s6294_s10 + $0x78] sm:$0xff] }
 0x3d0   : > { %4839 = vmatprep.subr.bf16.mxu0 %v5246_v16  ;;  %v4852_v62 = vpack.c.bf16 %v2376_v4, %v2375_v61 }
 0x3d1   : > { %v2115_v28 = vpop.permute.xlu0 %2114  ;;  %v2196_v30 = vpop.permute.xlu1 %2195  ;;  %4626 = vmatmul.mubr.msk.f32.vlgmr.msra.gmra.mrb[16].mxu1 %vm1649_vm7, %v1957_v6  ;;  %v4843_v6 = vpack.c.bf16 %v2370_v5, %v2369_v3 }
 0x3d2   : > { %v2117_v35 = vmul.f32 %v2115_v28, %v5856_v10  ;;  %4820 = vmatpush3.bf16.msra.mxu1 %v4819_v27  ;;  %4632 = vmatprep.mubr.msk.f32.mxu1 %vm5249_vm2, %v5229_v0  ;;  %v2198_v11 = vmul.f32 %v2196_v30, %v5848_v13 }
 0x3d3   : > { %4821 = vmatprep.subr.bf16.mxu1 %v5246_v16  ;;  %4841 = vmatpush3.bf16.msra.mxu0 %v4840_v2 }
 0x3d4   : > { %v4822_v15 = vpack.c.bf16 %v2117_v35, %v2116_v33  ;;  %v4825_v39 = vpack.c.bf16 %v2198_v11, %v2197_v36  ;;  %4842 = vmatprep.subr.bf16.mxu0 %v5246_v16 }
 0x3d5   : > { %v2119_v26 = vpop.permute.xlu0 %2118  ;;  %4633 = vmatmul.mubr.msk.f32.vlgmr.msra.gmra.mrb[18].mxu1 %vm1649_vm7, %v2038_v14  ;;  %v2275_v38 = vpop.permute.xlu1 %2274 }
 0x3d6   : > { %4823 = vmatpush3.bf16.msra.mxu1 %v4822_v15  ;;  %4639 = vmatprep.mubr.msk.f32.mxu1 %vm5249_vm2, %v5229_v0  ;;  %v2278_v43 = vmul.f32 %v2275_v38, %v5875_v37 }
 0x3d7   : > { %4824 = vmatprep.subr.bf16.mxu1 %v5246_v16  ;;  %4844 = vmatpush3.bf16.msra.mxu0 %v4843_v6  ;;  %v2456_v6 = vld [vmem:[#allocation4] sm:$0xff] }
 0x3d8   : > { %4845 = vmatprep.subr.bf16.mxu0 %v5246_v16 }
 0x3d9   : > { %v2277_v42 = vpop.permute.xlu0 %2276  ;;  %4640 = vmatmul.mubr.msk.f32.vlgmr.msra.gmra.mrb[20].mxu1 %vm1649_vm7, %v2119_v26  ;;  %v2200_v46 = vpop.permute.xlu1 %2199 }
 0x3da   : > { %v2279_v44 = vmul.f32 %v2277_v42, %v5875_v37  ;;  %4826 = vmatpush3.bf16.msra.mxu1 %v4825_v39  ;;  %4646 = vmatprep.mubr.msk.f32.mxu1 %vm5249_vm2, %v5229_v0 }
 0x3db   : > { %4827 = vmatprep.subr.bf16.mxu1 %v5246_v16  ;;  %4847 = vmatpush3.bf16.msra.mxu0 %v4846_v12 }
 0x3dc   : > { %v4828_v49 = vpack.c.bf16 %v2279_v44, %v2278_v43  ;;  %4848 = vmatprep.subr.bf16.mxu0 %v5246_v16 }
 0x3dd   : > { %4647 = vmatmul.mubr.msk.f32.vlgmr.msra.gmra.mrb[22].mxu1 %vm1649_vm7, %v2200_v46 }
 0x3de   : > { %4829 = vmatpush3.bf16.msra.mxu1 %v4828_v49  ;;  %4653 = vmatprep.mubr.msk.f32.mxu1 %vm5249_vm2, %v5229_v0 }
 0x3df   : > { %4854 = vmatprep.subr.bf16.mxu1 %v5246_v16  ;;  %4850 = vmatpush3.bf16.msra.mxu0 %v4849_v57 }
 0x3e0   : > { %4851 = vmatprep.subr.bf16.mxu0 %v5246_v16 }
 0x3e1   : > { %4654 = vmatmul.mubr.msk.f32.vlgmr.msra.gmra.mrb[24].mxu1 %vm1649_vm7, %v1632_v50 }
 0x3e2   : > { %4723 = vmatprep.mubr.msk.f32.mxu1 %vm5249_vm2, %v5229_v0 }
 0x3e3   : > { %4853 = vmatpush3.bf16.msra.mxu0 %v4852_v62  ;;  %v5964_v62 = vld [vmem:[%s6289_s5] sm:$0xff] }
 0x3ea   : > { %v2357_v5 = vpop.permute.xlu0 %2356 }
 0x494   : > { %v1718_v14 = vpop.f32.mrb[8].mxu1 }
 0x495   : > { %v4599_v25 = vpop.f32.mrb[9].mxu1 }
 0x496   : > { %v2459_v25 = vld [vmem:[#allocation4 + $0x18] sm:$0xff] }
 0x498   : > { %v1790_v27 = vpop.f32.mrb[10].mxu1 }
 0x499   : > { %v1791_v28 = vadd.f32 %v1790_v27, %v1718_v14  ;;  %v4606_v30 = vpop.f32.mrb[11].mxu1  ;;  %v4855_v14 = vpack.c.bf16 %v2457_v7, %v2456_v6  ;;  %v5979_v6 = vld [vmem:[%s6289_s5 + $0x8] sm:$0xff] }
 0x49a   : > { %v2460_v30 = vld [vmem:[#allocation4 + $0x20] sm:$0xff]  ;;  %v2545_v7 = vld [vmem:[%s6290_s6 + $0x8] sm:$0xff] }
 0x49b   : > { %4856 = vmatpush3.bf16.msra.mxu1 %v4855_v14  ;;  %v3347_v14 = vld [vmem:[#allocation6 + $0x18] sm:$0xff] }
 0x49c   : > { %v1870_v33 = vpop.f32.mrb[12].mxu1  ;;  %4857 = vmatprep.subr.bf16.mxu1 %v5246_v16 }
 0x49d   : > { %v1874_v35 = vadd.f32 %v1870_v33, %v1791_v28  ;;  %v4613_v15 = vpop.f32.mrb[13].mxu1  ;;  %v4858_v28 = vpack.c.bf16 %v2459_v25, %v2458_v8  ;;  %v2461_v33 = vld [vmem:[#allocation4 + $0x28] sm:$0xff]  ;;  %v2544_v8 = vld [vmem:[%s6290_s6] sm:$0xff] }
 0x49e   : > { %v2462_v15 = vld [vmem:[#allocation4 + $0x30] sm:$0xff]  ;;  %v3344_v25 = vld [vmem:[#allocation6] sm:$0xff] }
 0x49f   : > { %4859 = vmatpush3.bf16.msra.mxu1 %v4858_v28  ;;  %v3346_v28 = vld [vmem:[#allocation6 + $0x10] sm:$0xff] }
 0x4a0   : > { %v1951_v11 = vpop.f32.mrb[14].mxu1  ;;  %4860 = vmatprep.subr.bf16.mxu1 %v5246_v16 }
 0x4a1   : > { %v1955_v26 = vadd.f32 %v1951_v11, %v1874_v35  ;;  %v4620_v36 = vpop.f32.mrb[15].mxu1  ;;  %v4861_v35 = vpack.c.bf16 %v2461_v33, %v2460_v30  ;;  %v2463_v11 = vld [vmem:[#allocation4 + $0x38] sm:$0xff]  ;;  %v3349_v30 = vld [vmem:[#allocation6 + $0x28] sm:$0xff] }
 0x4a2   : > { %v2464_v36 = vld [vmem:[#allocation4 + $0x40] sm:$0xff]  ;;  %v3351_v33 = vld [vmem:[#allocation6 + $0x38] sm:$0xff] }
 0x4a3   : > { %4862 = vmatpush3.bf16.msra.mxu1 %v4861_v35  ;;  %v4880_v35 = vpack.c.bf16 %v3346_v28, %v3344_v25  ;;  %v3368_v28 = vld [vmem:[#allocation6 + $0xc0] sm:$0xff] }
 0x4a4   : > { %v2026_v38 = vpop.f32.mrb[16].mxu1  ;;  %4863 = vmatprep.subr.bf16.mxu1 %v5246_v16 }
 0x4a5   : > { %v2030_v39 = vadd.f32 %v2026_v38, %v1955_v26  ;;  %v4627_v42 = vpop.f32.mrb[17].mxu1  ;;  %v4864_v26 = vpack.c.bf16 %v2463_v11, %v2462_v15  ;;  %v2465_v38 = vld [vmem:[#allocation4 + $0x48] sm:$0xff]  ;;  %v4882_v15 = vpack.c.bf16 %v3351_v33, %v3349_v30  ;;  %v3348_v11 = vld [vmem:[#allocation6 + $0x20] sm:$0xff]  ;;  %v3370_v30 = vld [vmem:[#allocation6 + $0xd0] sm:$0xff] }
 0x4a6   : > { %v2466_v42 = vld [vmem:[#allocation4 + $0x50] sm:$0xff]  ;;  %v4904_v33 = vpack.c.bf16 %v3370_v30, %v3368_v28 }
 0x4a7   : > { %4865 = vmatpush3.bf16.msra.mxu1 %v4864_v26  ;;  %v3350_v26 = vld [vmem:[#allocation6 + $0x30] sm:$0xff] }
 0x4a8   : > { %v2107_v43 = vpop.f32.mrb[18].mxu1  ;;  %4866 = vmatprep.subr.bf16.mxu1 %v5246_v16 }
 0x4a9   : > { %v2111_v44 = vadd.f32 %v2107_v43, %v2030_v39  ;;  %v4634_v46 = vpop.f32.mrb[19].mxu1  ;;  %v4867_v39 = vpack.c.bf16 %v2465_v38, %v2464_v36  ;;  %v2467_v43 = vld [vmem:[#allocation4 + $0x58] sm:$0xff]  ;;  %v3353_v36 = vld [vmem:[#allocation6 + $0x48] sm:$0xff] }
 0x4aa   : > { %v2468_v46 = vld [vmem:[#allocation4 + $0x60] sm:$0xff]  ;;  %v3355_v38 = vld [vmem:[#allocation6 + $0x58] sm:$0xff] }
 0x4ab   : > { %4868 = vmatpush3.bf16.msra.mxu1 %v4867_v39  ;;  %v4884_v39 = vpack.c.bf16 %v3350_v26, %v3348_v11 }
 0x4ac   : > { %v2188_v49 = vpop.f32.mrb[20].mxu1  ;;  %4869 = vmatprep.subr.bf16.mxu1 %v5246_v16 }
 0x4ad   : > { %v2192_v50 = vadd.f32 %v2188_v49, %v2111_v44  ;;  %v4641_v51 = vpop.f32.mrb[21].mxu1  ;;  %v4870_v44 = vpack.c.bf16 %v2467_v43, %v2466_v42  ;;  %v2469_v49 = vld [vmem:[#allocation4 + $0x68] sm:$0xff]  ;;  %v4886_v42 = vpack.c.bf16 %v3355_v38, %v3353_v36  ;;  %v3352_v43 = vld [vmem:[#allocation6 + $0x40] sm:$0xff] }
 0x4ae   : > { %v2470_v51 = vld [vmem:[#allocation4 + $0x70] sm:$0xff] }
 0x4af   : > { %4871 = vmatpush3.bf16.msra.mxu1 %v4870_v44  ;;  %v4876_v55 = vpack.c.bf16 %v2471_v1, %v2470_v51  ;;  %v3354_v44 = vld [vmem:[#allocation6 + $0x50] sm:$0xff]  ;;  %v3356_v1 = vld [vmem:[#allocation6 + $0x60] sm:$0xff] }
 0x4b0   : > { %v2269_v58 = vpop.f32.mrb[22].mxu1  ;;  %4872 = vmatprep.subr.bf16.mxu1 %v5246_v16 }
 0x4b1   : > { %v2273_v59 = vadd.f32 %v2269_v58, %v2192_v50  ;;  %v4648_v60 = vpop.f32.mrb[23].mxu1  ;;  %v4873_v50 = vpack.c.bf16 %v2469_v49, %v2468_v46  ;;  %v3357_v46 = vld [vmem:[#allocation6 + $0x68] sm:$0xff]  ;;  %v3359_v49 = vld [vmem:[#allocation6 + $0x78] sm:$0xff] }
 0x4b2   : > { %v4890_v51 = vpack.c.bf16 %v3359_v49, %v3357_v46 }
 0x4b3   : > { %4874 = vmatpush3.bf16.msra.mxu1 %v4873_v50  ;;  %v4888_v50 = vpack.c.bf16 %v3354_v44, %v3352_v43 }
 0x4b4   : > { %v2349_v63 = vpop.f32.mrb[24].mxu1  ;;  %4875 = vmatprep.subr.bf16.mxu1 %v5246_v16 }
 0x4b5   : > { %v2353_v2 = vadd.f32 %v2349_v63, %v2273_v59  ;;  %v4655_v3 = vpop.f32.mrb[25].mxu1 }
 0x4b7   : > { %v2359_v12 = vadd.f32 %v2357_v5, %v2353_v2  ;;  %4877 = vmatpush3.bf16.msra.mxu1 %v4876_v55  ;;  %v3358_v55 = vld [vmem:[#allocation6 + $0x70] sm:$0xff] }
 0x4b9   : > { %v2360_v27 = vmax.f32 %v2359_v12, 0.0  ;;  %v3345_v12 = vld [vmem:[#allocation6 + $0x8] sm:$0xff] }
 0x4bb   : > { %2380 = vrot.lane.b32.xlu0 %v2360_v27, %s5255_s19  ;;  %2377 = vrot.lane.b32.xlu1 %v2360_v27, %s5234_s14 }
 0x4bf   : > { %2382 = vrot.lane.b32.xlu1 %v2360_v27, %s5233_s30 }
 0x4c3   : > { %2554 = vrot.lane.b32.xlu1 %v5964_v62, %s5255_s19 }
 0x52d   : > { %v2378_v57 = vpop.permute.xlu1 %2377  ;;  %v2381_v58 = vpop.permute.xlu0 %2380 }
 0x52e   : > { %v2379_v60 = vmax.f32 %v2360_v27, %v2378_v57  ;;  %v4878_v27 = vpack.c.bf16 %v3347_v14, %v3345_v12  ;;  %v3361_v57 = vld [vmem:[#allocation6 + $0x88] sm:$0xff]  ;;  %v3371_v14 = vld [vmem:[#allocation6 + $0xd8] sm:$0xff] }
 0x52f   : > { %v3369_v12 = vld [vmem:[#allocation6 + $0xc8] sm:$0xff] }
 0x530   : > { %4879 = vmatprep.subr.bf16.mxu1 %v4878_v27  ;;  %v4902_v27 = vpack.c.bf16 %v3371_v14, %v3369_v12 }
 0x531   : > { %v2383_v59 = vpop.permute.xlu1 %2382 }
 0x532   : > { %v2384_v61 = vmax.f32 %v2381_v58, %v2383_v59  ;;  %v3363_v58 = vld [vmem:[#allocation6 + $0x98] sm:$0xff]  ;;  %v4892_v59 = vpack.c.bf16 %v3358_v55, %v3356_v1 }
 0x534   : > { %v2385_v4 = vmax.f32 %v2379_v60, %v2384_v61  ;;  %v4894_v60 = vpack.c.bf16 %v3363_v58, %v3361_v57  ;;  %v3360_v61 = vld [vmem:[#allocation6 + $0x80] sm:$0xff] }
 0x535   : > { %v2555_v16 = vpop.permute.xlu1 %2554 }
 0x536   : > { %4689 = vmatmul.mubr.f32.vlgmr.msra.gmra.mrb[4].mxu0 %v2385_v4  ;;  %v3362_v4 = vld [vmem:[#allocation6 + $0x90] sm:$0xff] }
 0x537   : > { %4728 = vmatprep.mubr.msk.f32.mxu0 %vm2558_vm11, %v2555_v16  ;;  %v4896_v16 = vpack.c.bf16 %v3362_v4, %v3360_v61  ;;  %v3373_v4 = vld [vmem:[#allocation6 + $0xe8] sm:$0xff] }
 0x609   : > { %v2452_v63 = vpop.f32.mrb[4].mxu0 }
 0x60a   : > { %v4690_v2 = vpop.f32.mrb[5].mxu0  ;;  %4724 = vmatmul.mubr.f32.vlgmr.msra.gmra.mrb[26].mxu1 %v2452_v63  ;;  %v3365_v63 = vld [vmem:[#allocation6 + $0xa8] sm:$0xff] }
 0x60b   : > { %3440 = vmatprep.mubr.f32.mxu1 %v5229_v0  ;;  %4881 = vmatpush1.bf16.msra.mxu1 %v4880_v35  ;;  %v3367_v2 = vld [vmem:[#allocation6 + $0xb8] sm:$0xff] }
 0x60c   : > { %4883 = vmatprep.subr.bf16.mxu1 %v4882_v15 }
 0x60f   : > { %4885 = vmatpush1.bf16.msra.mxu1 %v4884_v39 }
 0x610   : > { %4887 = vmatprep.subr.bf16.mxu1 %v4886_v42 }
 0x613   : > { %4889 = vmatpush1.bf16.msra.mxu1 %v4888_v50 }
 0x614   : > { %4891 = vmatprep.subr.bf16.mxu1 %v4890_v51 }
 0x617   : > { %4893 = vmatpush1.bf16.msra.mxu1 %v4892_v59 }
 0x618   : > { %4895 = vmatprep.subr.bf16.mxu1 %v4894_v60 }
 0x61b   : > { %4897 = vmatpush1.bf16.msra.mxu1 %v4896_v16  ;;  %v3374_v16 = vld [vmem:[#allocation6 + $0xf0] sm:$0xff] }
 0x6dd   : > { %v5970_v3 = vpop.f32.mrb[26].mxu1 }
 0x6de   : > { %2546 = vrot.lane.b32.xlu1 %v5970_v3, %s5250_s16  ;;  %2549 = vrot.lane.b32.xlu0 %v5970_v3, %s5248_s28  ;;  %v4725_v5 = vpop.f32.mrb[27].mxu1  ;;  %s6326_s16 = smov 104   ;;  %s6327_s28 = smov 96  }
 0x6df   : > { %v4898_v5 = vpack.c.bf16 %v3367_v2, %v3365_v63  ;;  %v3372_v2 = vld [vmem:[#allocation6 + $0xe0] sm:$0xff] }
 0x6e1   : > { %4899 = vmatprep.subr.bf16.mxu1 %v4898_v5  ;;  %v4908_v5 = vpack.c.bf16 %v3374_v16, %v3372_v2 }
 0x6e2   : > { %2720 = vrot.lane.b32.xlu1 %v5964_v62, %s5239_s15  ;;  %2556 = vrot.lane.b32.xlu0 %v5979_v6, %s5255_s19 }
 0x6e6   : > { %2805 = vrot.lane.b32.xlu1 %v5970_v3, %s5232_s22  ;;  %2717 = vrot.lane.b32.xlu0 %v5970_v3, %s5247_s24  ;;  %s6329_s24 = smov 80  }
 0x6ea   : > { %2810 = vrot.lane.b32.xlu1 %v5979_v6, %s6326_s16  ;;  %2722 = vrot.lane.b32.xlu0 %v5979_v6, %s5239_s15 }
 0x6ee   : > { %2895 = vrot.lane.b32.xlu1 %v5979_v6, %s6327_s28  ;;  %2808 = vrot.lane.b32.xlu0 %v5964_v62, %s6326_s16 }
 0x6f2   : > { %2981 = vrot.lane.b32.xlu1 %v5964_v62, %s5258_s21  ;;  %2893 = vrot.lane.b32.xlu0 %v5964_v62, %s6327_s28 }
 0x6f6   : > { %3066 = vrot.lane.b32.xlu1 %v5970_v3, %s6328_s29  ;;  %2978 = vrot.lane.b32.xlu0 %v5970_v3, %s5234_s14  ;;  %s6334_s29 = smov 113  }
 0x6fa   : > { %3071 = vrot.lane.b32.xlu1 %v5979_v6, %s6329_s24  ;;  %2983 = vrot.lane.b32.xlu0 %v5979_v6, %s5258_s21  ;;  %s6333_s21 = smov 15  }
 0x6fe   : > { %3157 = vrot.lane.b32.xlu1 %v5964_v62, %s5259_s27  ;;  %3069 = vrot.lane.b32.xlu0 %v5964_v62, %s6329_s24 }
 0x702   : > { %3242 = vrot.lane.b32.xlu1 %v5970_v3, %s5233_s30  ;;  %3154 = vrot.lane.b32.xlu0 %v5970_v3, %s5255_s19  ;;  %s6331_s30 = smov 16   ;;  %s6332_s19 = smov 17  }
 0x706   : > { %3247 = vrot.lane.b32.xlu1 %v5979_v6, %s6330_s13  ;;  %3159 = vrot.lane.b32.xlu0 %v5979_v6, %s5259_s27  ;;  %s6338_s27 = sshll.u32 %s6342_s26, 3 }
 0x707   : > { %s484_s18 = scalar_lea.vmem %s6339_s23, %s6338_s27 }
 0x70a   : > { %3337 = vperm.xlu1 %5085, %v2545_v7   ;;  %3245 = vrot.lane.b32.xlu0 %v5964_v62, %s6330_s13  ;;  %v3364_v7 = vld [vmem:[#allocation6 + $0xa0] sm:$0xff] }
 0x70e   : > { %3332 = vperm.xlu0 %5084, %v2544_v8   ;;  %v3366_v8 = vld [vmem:[#allocation6 + $0xb0] sm:$0xff] }
 0x70f   : > { %v4900_v25 = vpack.c.bf16 %v3366_v8, %v3364_v7 }
 0x711   : > { %4901 = vmatpush1.bf16.msra.mxu1 %v4900_v25 }
 0x712   : > { %4903 = vmatprep.subr.bf16.mxu1 %v4902_v27 }
 0x715   : > { %4905 = vmatpush1.bf16.msra.mxu1 %v4904_v33 }
 0x750   : > { %v2547_v35 = vpop.permute.xlu1 %2546  ;;  %v2550_v15 = vpop.permute.xlu0 %2549 }
 0x751   : > { %v2551_v11 = vmul.f32 %v2550_v15, %v5813_v41  ;;  %v2548_v26 = vmul.f32 %v2547_v35, %v5818_v45 }
 0x753   : > { %4726 = vmatprep.subr.mxu0 %v2551_v11 }
 0x754   : > { %v2721_v36 = vpop.permute.xlu1 %2720  ;;  %4727 = vmatpush3.msra.mxu0 %v2551_v11  ;;  %v2557_v38 = vpop.permute.xlu0 %2556 }
 0x755   : > { %4729 = vmatmul.mubr.msk.f32.vlgmr.msra.gmra.mrb[6].mxu0 %vm2558_vm11, %v2557_v38  ;;  %4731 = vmatprep.subr.mxu0 %v2548_v26  ;;  %v6081_v38 = vld [vmem:[%s6291_s7] sm:$0x77] }
 0x756   : > { %4732 = vmatpush3.msra.mxu0 %v2548_v26  ;;  %4733 = vmatprep.mubr.msk.f32.mxu0 %vm2558_vm11, %v5964_v62 }
 0x758   : > { %v2806_v39 = vpop.permute.xlu1 %2805  ;;  %v2718_v42 = vpop.permute.xlu0 %2717 }
 0x759   : > { %v2719_v43 = vmul.f32 %v2718_v42, %v5826_v54  ;;  %v2807_v41 = vmul.f32 %v2806_v39, %v5810_v40  ;;  %v3454_v39 = vld [vmem:[%s6292_s8] sm:$0x7] }
 0x75b   : > { %4736 = vmatprep.subr.mxu0 %v2719_v43 }
 0x75c   : > { %v2723_v44 = vpop.permute.xlu0 %2722  ;;  %v2811_v45 = vpop.permute.xlu1 %2810 }
 0x75d   : > { %4734 = vmatmul.mubr.msk.f32.vlgmr.msra.gmra.mrb[6].mxu0 %vm2558_vm11, %v5979_v6 }
 0x75e   : > { %4737 = vmatpush3.msra.mxu0 %v2719_v43  ;;  %4738 = vmatprep.mubr.msk.f32.mxu0 %vm2558_vm11, %v2721_v36 }
 0x75f   : > { %4741 = vmatprep.subr.mxu0 %v2807_v41 }
 0x760   : > { %v2809_v46 = vpop.permute.xlu0 %2808  ;;  %v2896_v49 = vpop.permute.xlu1 %2895 }
 0x764   : > { %v2894_v50 = vpop.permute.xlu0 %2893  ;;  %v2982_v40 = vpop.permute.xlu1 %2981 }
 0x765   : > { %4739 = vmatmul.mubr.msk.f32.vlgmr.msra.gmra.mrb[6].mxu0 %vm2558_vm11, %v2723_v44 }
 0x766   : > { %4742 = vmatpush3.msra.mxu0 %v2807_v41  ;;  %4743 = vmatprep.mubr.msk.f32.mxu0 %vm2558_vm11, %v2809_v46 }
 0x767   : > { %4746 = vmatprep.subr.mxu0 %v5970_v3 }
 0x768   : > { %v2979_v54 = vpop.permute.xlu0 %2978  ;;  %v3067_v51 = vpop.permute.xlu1 %3066 }
 0x769   : > { %v2980_v62 = vmul.f32 %v2979_v54, %v5822_v47  ;;  %v3068_v55 = vmul.f32 %v3067_v51, %v5856_v10 }
 0x76c   : > { %v2984_v6 = vpop.permute.xlu0 %2983  ;;  %v3072_v57 = vpop.permute.xlu1 %3071 }
 0x76d   : > { %4744 = vmatmul.mubr.msk.f32.vlgmr.msra.gmra.mrb[6].mxu0 %vm2558_vm11, %v2811_v45 }
 0x76e   : > { %4747 = vmatpush3.msra.mxu0 %v5970_v3  ;;  %4748 = vmatprep.mubr.msk.f32.mxu0 %vm2558_vm11, %v2894_v50 }
 0x76f   : > { %4751 = vmatprep.subr.mxu0 %v2980_v62 }
 0x770   : > { %v3070_v1 = vpop.permute.xlu0 %3069  ;;  %v3158_v58 = vpop.permute.xlu1 %3157 }
 0x774   : > { %v3155_v47 = vpop.permute.xlu0 %3154  ;;  %v3243_v3 = vpop.permute.xlu1 %3242 }
 0x775   : > { %4749 = vmatmul.mubr.msk.f32.vlgmr.msra.gmra.mrb[6].mxu0 %vm2558_vm11, %v2896_v49  ;;  %v3156_v59 = vmul.f32 %v3155_v47, %v5848_v13  ;;  %v3244_v10 = vmul.f32 %v3243_v3, %v5875_v37  ;;  %v3375_v37 = vld [vmem:[#allocation6 + $0xf8] sm:$0xff] }
 0x776   : > { %4752 = vmatpush3.msra.mxu0 %v2980_v62  ;;  %4753 = vmatprep.mubr.msk.f32.mxu0 %vm2558_vm11, %v2982_v40  ;;  %v4906_v63 = vpack.c.bf16 %v3375_v37, %v3373_v4 }
 0x777   : > { %4756 = vmatprep.subr.mxu0 %v3068_v55 }
 0x778   : > { %v3160_v60 = vpop.permute.xlu0 %3159  ;;  %v3248_v13 = vpop.permute.xlu1 %3247  ;;  %4907 = vmatprep.subr.bf16.mxu1 %v4906_v63 }
 0x779   : > { %4909 = vmatpush1.bf16.msra.mxu1 %v4908_v5 }
 0x77c   : > { %v3246_v61 = vpop.permute.xlu0 %3245 }
 0x77d   : > { %4754 = vmatmul.mubr.msk.f32.vlgmr.msra.gmra.mrb[6].mxu0 %vm2558_vm11, %v2984_v6 }
 0x77e   : > { %4757 = vmatpush3.msra.mxu0 %v3068_v55  ;;  %4758 = vmatprep.mubr.msk.f32.mxu0 %vm2558_vm11, %v3070_v1 }
 0x77f   : > { %4761 = vmatprep.subr.mxu0 %v3156_v59 }
 0x785   : > { %4759 = vmatmul.mubr.msk.f32.vlgmr.msra.gmra.mrb[6].mxu0 %vm2558_vm11, %v3072_v57 }
 0x786   : > { %4762 = vmatpush3.msra.mxu0 %v3156_v59  ;;  %4763 = vmatprep.mubr.msk.f32.mxu0 %vm2558_vm11, %v3158_v58 }
 0x787   : > { %4766 = vmatprep.subr.mxu0 %v3244_v10 }
 0x789   : > { %v3338_v25 = vpop.permute.xlu1 %3337 }
 0x78d   : > { %4764 = vmatmul.mubr.msk.f32.vlgmr.msra.gmra.mrb[6].mxu0 %vm2558_vm11, %v3160_v60  ;;  %v3333_v8 = vpop.permute.xlu0 %3332 }
 0x78e   : > { %4767 = vmatpush3.msra.mxu0 %v3244_v10  ;;  %4768 = vmatprep.mubr.msk.f32.mxu0 %vm2558_vm11, %v3246_v61 }
 0x795   : > { %4769 = vmatmul.mubr.msk.f32.vlgmr.msra.gmra.mrb[6].mxu0 %vm2558_vm11, %v3248_v13 }
 0x796   : > { %3556 = vmatprep.mubr.f32.mxu0 %v5229_v0 }
 0x868   : > { %v4770_v7 = vpop.f32.mrb[6].mxu0 }
 0x869   : > { %v3319_v12 = vpop.f32.mrb[7].mxu0  ;;  %v3341_v27 = vadd.f32 %v4770_v7, %v3338_v25 }
 0x86a   : > { %v3340_v14 = vadd.f32 %v3333_v8, %v3319_v12 }
 0x86b   : > { %v3343_v30 = vmax.f32 %v3341_v27, 0.0 }
 0x86c   : > { %v3342_v28 = vmax.f32 %v3340_v14, 0.0 }
 0x86e   : > { %3441 = vmatmul.mubr.f32.vlgmr.msra.gmra.mrb[28].mxu1 %v3342_v28 }
 0x86f   : > { %3446 = vmatprep.mubr.f32.mxu1 %v5229_v0 }
 0x872   : > { %3447 = vmatmul.mubr.f32.gmra.mrb[30].mxu1 %v3343_v30 }
 0x941   : > { %v6056_v33 = vpop.f32.mrb[28].mxu1 }
 0x942   : > { %3471 = vrot.lane.b32.xlu0 %v6056_v33, %s6331_s30  ;;  %v6060_v35 = vpop.f32.mrb[29].mxu1 }
 0x945   : > { %v6062_v15 = vpop.f32.mrb[30].mxu1 }
 0x946   : > { %3455 = vrot.lane.b32.xlu0 %v6056_v33, %s6332_s19  ;;  %3473 = vrot.lane.b32.xlu1 %v6062_v15, %s6331_s30  ;;  %v6068_v11 = vpop.f32.mrb[31].mxu1  ;;  %v4928_v26 = vpack.c.bf16 %v6062_v15, %v6056_v33 }
 0x947   : > { %v4926_v36 = vpack.c.bf16 %v6068_v11, %v6060_v35 }
 0x94a   : > { %3475 = vrot.lane.b32.xlu0 %v6060_v35, %s6331_s30  ;;  %3457 = vrot.lane.b32.xlu1 %v6062_v15, %s6332_s19 }
 0x94e   : > { %3488 = vrot.lane.b32.xlu0 %v6081_v38, %s5239_s15  ;;  %3477 = vrot.lane.b32.xlu1 %v6068_v11, %s6331_s30 }
 0x952   : > { %3459 = vrot.lane.b32.xlu0 %v6060_v35, %s6332_s19  ;;  %3636 = vrot.lane.b32.xlu1 %v6056_v33, %s6333_s21 }
 0x956   : > { %3638 = vrot.lane.b32.xlu0 %v6062_v15, %s6333_s21  ;;  %3461 = vrot.lane.b32.xlu1 %v6068_v11, %s6332_s19 }
 0x95a   : > { %3642 = vrot.lane.b32.xlu0 %v6068_v11, %s6333_s21  ;;  %3640 = vrot.lane.b32.xlu1 %v6060_v35, %s6333_s21 }
 0x95e   : > { %3731 = vrot.lane.b32.xlu0 %v6062_v15, %s5232_s22  ;;  %3729 = vrot.lane.b32.xlu1 %v6056_v33, %s5232_s22 }
 0x962   : > { %3735 = vrot.lane.b32.xlu0 %v6068_v11, %s5232_s22  ;;  %3733 = vrot.lane.b32.xlu1 %v6060_v35, %s5232_s22  ;;  %s6335_s22 = smov 48  }
 0x966   : > { %3745 = vrot.lane.b32.xlu0 %v6081_v38, %s6329_s24  ;;  %3652 = vrot.lane.b32.xlu1 %v6081_v38, %s6327_s28  ;;  %s6337_s28 = smov 32  }
 0x96a   : > { %3901 = vrot.lane.b32.xlu0 %v6062_v15, %s5234_s14  ;;  %3899 = vrot.lane.b32.xlu1 %v6056_v33, %s5234_s14 }
 0x96e   : > { %3992 = vrot.lane.b32.xlu0 %v6056_v33, %s6334_s29  ;;  %3903 = vrot.lane.b32.xlu1 %v6060_v35, %s5234_s14 }
 0x972   : > { %3905 = vrot.lane.b32.xlu0 %v6068_v11, %s5234_s14  ;;  %3822 = vrot.lane.b32.xlu1 %v6081_v38, %s6330_s13  ;;  %s6336_s14 = smov 111  }
 0x976   : > { %3996 = vrot.lane.b32.xlu0 %v6060_v35, %s6334_s29  ;;  %3994 = vrot.lane.b32.xlu1 %v6062_v15, %s6334_s29 }
 0x97a   : > { %3915 = vrot.lane.b32.xlu0 %v6081_v38, %s6335_s22  ;;  %4085 = vrot.lane.b32.xlu1 %v6056_v33, %s5239_s15 }
 0x97e   : > { %4087 = vrot.lane.b32.xlu0 %v6062_v15, %s5239_s15  ;;  %3998 = vrot.lane.b32.xlu1 %v6068_v11, %s6334_s29 }
 0x982   : > { %4091 = vrot.lane.b32.xlu0 %v6068_v11, %s5239_s15  ;;  %4089 = vrot.lane.b32.xlu1 %v6060_v35, %s5239_s15 }
 0x986   : > { %4178 = vrot.lane.b32.xlu0 %v6056_v33, %s6336_s14  ;;  %4008 = vrot.lane.b32.xlu1 %v6081_v38, %s6337_s28 }
 0x98a   : > { %4182 = vrot.lane.b32.xlu0 %v6060_v35, %s6336_s14  ;;  %4180 = vrot.lane.b32.xlu1 %v6062_v15, %s6336_s14 }
 0x98e   : > { %4184 = vrot.lane.b32.xlu1 %v6068_v11, %s6336_s14  ;;  %4101 = vrot.lane.b32.xlu0 %v6081_v38, %s6331_s30 }
 0x992   : > { %4272 = vperm.xlu1 %5085, %v3454_v39  }
 0x9b4   : > { %v3472_v42 = vpop.permute.xlu0 %3471 }
 0x9b8   : > { %v3456_v43 = vpop.permute.xlu0 %3455  ;;  %v3474_v44 = vpop.permute.xlu1 %3473 }
 0x9bc   : > { %v3476_v41 = vpop.permute.xlu0 %3475  ;;  %v3458_v45 = vpop.permute.xlu1 %3457 }
 0x9bd   : > { %v3479_v46 = vsel %vm554_vm14, %v3472_v42, %v3476_v41  ;;  %v3481_v49 = vsel %vm554_vm14, %v3476_v41, %v3472_v42 }
 0x9be   : > { %v3483_v6 = vmul.f32 %v3481_v49, %v5549_v19  ;;  %v3484_v51 = vmul.f32 %v3479_v46, %v5543_v17 }
 0x9c0   : > { %v3489_v50 = vpop.permute.xlu0 %3488  ;;  %v3478_v54 = vpop.permute.xlu1 %3477 }
 0x9c1   : > { %v3480_v40 = vsel %vm554_vm14, %v3474_v44, %v3478_v54  ;;  %v3482_v62 = vsel %vm554_vm14, %v3478_v54, %v3474_v44 }
 0x9c2   : > { %v3485_v1 = vmul.f32 %v3482_v62, %v5549_v19  ;;  %v3486_v55 = vmul.f32 %v3480_v40, %v5543_v17 }
 0x9c4   : > { %v4912_v57 = vpack.c.bf16 %v3485_v1, %v3483_v6  ;;  %v3460_v47 = vpop.permute.xlu0 %3459  ;;  %v3637_v58 = vpop.permute.xlu1 %3636  ;;  %v4910_v59 = vpack.c.bf16 %v3486_v55, %v3484_v51 }
 0x9c5   : > { %v3463_v3 = vsel %vm545_vm0, %v3456_v43, %v3460_v47  ;;  %v3465_v10 = vsel %vm545_vm0, %v3460_v47, %v3456_v43 }
 0x9c6   : > { %4911 = vmatprep.subr.bf16.mxu0 %v4910_v59  ;;  %v3467_v19 = vmul.f32 %v3465_v10, %v5664_v21  ;;  %v3468_v4 = vmul.f32 %v3463_v3, %v5668_v22 }
 0x9c7   : > { %4913 = vmatpush1.bf16.msra.mxu0 %v4912_v57 }
 0x9c8   : > { %v3639_v60 = vpop.permute.xlu0 %3638  ;;  %v3462_v61 = vpop.permute.xlu1 %3461 }
 0x9c9   : > { %v3464_v13 = vsel %vm545_vm0, %v3458_v45, %v3462_v61  ;;  %v3466_v17 = vsel %vm545_vm0, %v3462_v61, %v3458_v45 }
 0x9ca   : > { %v3469_v37 = vmul.f32 %v3466_v17, %v5664_v21  ;;  %v3470_v63 = vmul.f32 %v3464_v13, %v5668_v22  ;;  %4454 = vmatmul.mubr.msk.f32.vlgmr.msra.gmra.mrb[8].mxu0 %vm1649_vm7, %v3489_v50 }
 0x9cb   : > { %3629 = vmatprep.mubr.f32.mxu0 %v5229_v0 }
 0x9cc   : > { %v4916_v2 = vpack.c.bf16 %v3469_v37, %v3467_v19  ;;  %v3643_v16 = vpop.permute.xlu0 %3642  ;;  %v3641_v5 = vpop.permute.xlu1 %3640  ;;  %v4914_v7 = vpack.c.bf16 %v3470_v63, %v3468_v4 }
 0x9cd   : > { %v3645_v8 = vsel %vm745_vm4, %v3639_v60, %v3643_v16  ;;  %v3647_v12 = vsel %vm745_vm4, %v3643_v16, %v3639_v60  ;;  %v3644_v14 = vsel %vm745_vm4, %v3637_v58, %v3641_v5  ;;  %v3646_v21 = vsel %vm745_vm4, %v3641_v5, %v3637_v58 }
 0x9ce   : > { %v3650_v22 = vmul.f32 %v3647_v12, %v5561_v24  ;;  %v3651_v25 = vmul.f32 %v3645_v8, %v5557_v23  ;;  %v3648_v27 = vmul.f32 %v3646_v21, %v5561_v24  ;;  %v3649_v28 = vmul.f32 %v3644_v14, %v5557_v23  ;;  %4915 = vmatprep.subr.bf16.mxu0 %v4914_v7 }
 0x9cf   : > { %4917 = vmatpush1.bf16.msra.mxu0 %v4916_v2 }
 0x9d0   : > { %v4920_v30 = vpack.c.bf16 %v3650_v22, %v3648_v27  ;;  %v3732_v39 = vpop.permute.xlu0 %3731  ;;  %v3730_v42 = vpop.permute.xlu1 %3729  ;;  %v4918_v43 = vpack.c.bf16 %v3651_v25, %v3649_v28 }
 0x9d2   : > { %4455 = vmatmul.mubr.msk.f32.vlgmr.msra.gmra.mrb[8].mxu0 %vm1649_vm7, %v6081_v38  ;;  %4919 = vmatprep.subr.bf16.mxu0 %v4918_v43 }
 0x9d3   : > { %4921 = vmatpush1.bf16.msra.mxu0 %v4920_v30  ;;  %3720 = vmatprep.mubr.f32.mxu0 %v5229_v0 }
 0x9d4   : > { %v3736_v44 = vpop.permute.xlu0 %3735  ;;  %v3734_v41 = vpop.permute.xlu1 %3733 }
 0x9d5   : > { %v3738_v24 = vsel %vm849_vm8, %v3732_v39, %v3736_v44  ;;  %v3740_v23 = vsel %vm849_vm8, %v3736_v44, %v3732_v39  ;;  %v3737_v45 = vsel %vm849_vm8, %v3730_v42, %v3734_v41  ;;  %v3739_v46 = vsel %vm849_vm8, %v3734_v41, %v3730_v42 }
 0x9d6   : > { %v3743_v49 = vmul.f32 %v3740_v23, %v5571_v31  ;;  %v3744_v50 = vmul.f32 %v3738_v24, %v5574_v32  ;;  %v3741_v54 = vmul.f32 %v3739_v46, %v5571_v31  ;;  %v3742_v40 = vmul.f32 %v3737_v45, %v5574_v32 }
 0x9d8   : > { %v4924_v62 = vpack.c.bf16 %v3743_v49, %v3741_v54  ;;  %v3746_v6 = vpop.permute.xlu0 %3745  ;;  %v3653_v51 = vpop.permute.xlu1 %3652  ;;  %v4922_v1 = vpack.c.bf16 %v3744_v50, %v3742_v40 }
 0x9da   : > { %4456 = vmatmul.mubr.msk.f32.vlgmr.msra.gmra.mrb[8].mxu0 %vm1649_vm7, %v3653_v51  ;;  %4923 = vmatprep.subr.bf16.mxu0 %v4922_v1 }
 0x9db   : > { %4925 = vmatpush1.bf16.msra.mxu0 %v4924_v62  ;;  %3813 = vmatprep.mubr.f32.mxu0 %v5229_v0 }
 0x9dc   : > { %v3902_v55 = vpop.permute.xlu0 %3901  ;;  %v3900_v57 = vpop.permute.xlu1 %3899  ;;  %4927 = vmatprep.subr.bf16.mxu0 %v4926_v36 }
 0x9e0   : > { %v3993_v47 = vpop.permute.xlu0 %3992  ;;  %v3904_v31 = vpop.permute.xlu1 %3903 }
 0x9e1   : > { %v3907_v32 = vsel %vm1046_vm10, %v3900_v57, %v3904_v31  ;;  %v3909_v58 = vsel %vm1046_vm10, %v3904_v31, %v3900_v57  ;;  %v4194_v57 = vcombine.high %v6081_v38, %v6081_v38 }
 0x9e2   : > { %4457 = vmatmul.mubr.msk.f32.vlgmr.msra.gmra.mrb[8].mxu0 %vm1649_vm7, %v3746_v6  ;;  %v3911_v36 = vmul.f32 %v3907_v32, %v5552_v20  ;;  %v3912_v10 = vmul.f32 %v3909_v58, %v5546_v18 }
 0x9e3   : > { %4929 = vmatpush1.bf16.msra.mxu0 %v4928_v26  ;;  %3890 = vmatprep.mubr.f32.mxu0 %v5229_v0 }
 0x9e4   : > { %v3906_v59 = vpop.permute.xlu0 %3905  ;;  %v3823_v3 = vpop.permute.xlu1 %3822 }
 0x9e5   : > { %v3908_v35 = vsel %vm1046_vm10, %v3902_v55, %v3906_v59  ;;  %v3910_v11 = vsel %vm1046_vm10, %v3906_v59, %v3902_v55 }
 0x9e6   : > { %v3913_v60 = vmul.f32 %v3908_v35, %v5552_v20  ;;  %v3914_v61 = vmul.f32 %v3910_v11, %v5546_v18 }
 0x9e8   : > { %v4932_v33 = vpack.c.bf16 %v3913_v60, %v3911_v36  ;;  %v3997_v15 = vpop.permute.xlu0 %3996  ;;  %v3995_v26 = vpop.permute.xlu1 %3994  ;;  %v4930_v13 = vpack.c.bf16 %v3914_v61, %v3912_v10 }
 0x9e9   : > { %v4000_v4 = vsel %vm1150_vm13, %v3993_v47, %v3997_v15  ;;  %v4002_v20 = vsel %vm1150_vm13, %v3997_v15, %v3993_v47 }
 0x9ea   : > { %4458 = vmatmul.mubr.msk.f32.vlgmr.msra.gmra.mrb[8].mxu0 %vm1649_vm7, %v3823_v3  ;;  %4931 = vmatprep.subr.bf16.mxu0 %v4930_v13  ;;  %v4004_v16 = vmul.f32 %v4000_v4, %v5624_v56  ;;  %v4005_v5 = vmul.f32 %v4002_v20, %v5617_v53 }
 0x9eb   : > { %4933 = vmatpush1.bf16.msra.mxu0 %v4932_v33  ;;  %3983 = vmatprep.mubr.f32.mxu0 %v5229_v0 }
 0x9ec   : > { %v3916_v17 = vpop.permute.xlu0 %3915  ;;  %v4086_v19 = vpop.permute.xlu1 %4085 }
 0x9f0   : > { %v4088_v37 = vpop.permute.xlu0 %4087  ;;  %v3999_v18 = vpop.permute.xlu1 %3998 }
 0x9f1   : > { %v4001_v63 = vsel %vm1150_vm13, %v3995_v26, %v3999_v18  ;;  %v4003_v2 = vsel %vm1150_vm13, %v3999_v18, %v3995_v26 }
 0x9f2   : > { %v4006_v7 = vmul.f32 %v4001_v63, %v5624_v56  ;;  %v4007_v8 = vmul.f32 %v4003_v2, %v5617_v53  ;;  %4459 = vmatmul.mubr.msk.f32.vlgmr.msra.gmra.mrb[8].mxu0 %vm1649_vm7, %v3916_v17 }
 0x9f3   : > { %4076 = vmatprep.mubr.f32.mxu0 %v5229_v0 }
 0x9f4   : > { %v4936_v12 = vpack.c.bf16 %v4006_v7, %v4004_v16  ;;  %v4092_v14 = vpop.permute.xlu0 %4091  ;;  %v4090_v21 = vpop.permute.xlu1 %4089  ;;  %v4934_v22 = vpack.c.bf16 %v4007_v8, %v4005_v5 }
 0x9f5   : > { %v4094_v25 = vsel %vm1254_vm15, %v4088_v37, %v4092_v14  ;;  %v4096_v27 = vsel %vm1254_vm15, %v4092_v14, %v4088_v37  ;;  %v4093_v28 = vsel %vm1254_vm15, %v4086_v19, %v4090_v21  ;;  %v4095_v53 = vsel %vm1254_vm15, %v4090_v21, %v4086_v19 }
 0x9f6   : > { %v4099_v56 = vmul.f32 %v4094_v25, %v5613_v52  ;;  %v4100_v30 = vmul.f32 %v4096_v27, %v5607_v48  ;;  %v4097_v39 = vmul.f32 %v4093_v28, %v5613_v52  ;;  %v4098_v42 = vmul.f32 %v4095_v53, %v5607_v48  ;;  %4935 = vmatprep.subr.bf16.mxu0 %v4934_v22 }
 0x9f7   : > { %4937 = vmatpush1.bf16.msra.mxu0 %v4936_v12 }
 0x9f8   : > { %v4940_v43 = vpack.c.bf16 %v4099_v56, %v4097_v39  ;;  %v4179_v44 = vpop.permute.xlu0 %4178  ;;  %v4009_v41 = vpop.permute.xlu1 %4008  ;;  %v4938_v24 = vpack.c.bf16 %v4100_v30, %v4098_v42 }
 0x9fa   : > { %4460 = vmatmul.mubr.msk.f32.vlgmr.msra.gmra.mrb[8].mxu0 %vm1649_vm7, %v4009_v41  ;;  %4939 = vmatprep.subr.bf16.mxu0 %v4938_v24 }
 0x9fb   : > { %4941 = vmatpush1.bf16.msra.mxu0 %v4940_v43  ;;  %4169 = vmatprep.mubr.f32.mxu0 %v5229_v0 }
 0x9fc   : > { %v4183_v23 = vpop.permute.xlu0 %4182  ;;  %v4181_v45 = vpop.permute.xlu1 %4180 }
 0x9fd   : > { %v4186_v46 = vsel %vm1358_vm1, %v4179_v44, %v4183_v23  ;;  %v4188_v48 = vsel %vm1358_vm1, %v4183_v23, %v4179_v44 }
 0x9fe   : > { %v4190_v40 = vmul.f32 %v4186_v46, %v5679_v29  ;;  %v4191_v62 = vmul.f32 %v4188_v48, %v5686_v34 }
 0xa00   : > { %v4185_v52 = vpop.permute.xlu1 %4184  ;;  %v4102_v49 = vpop.permute.xlu0 %4101 }
 0xa01   : > { %v4187_v50 = vsel %vm1358_vm1, %v4181_v45, %v4185_v52  ;;  %v4189_v54 = vsel %vm1358_vm1, %v4185_v52, %v4181_v45 }
 0xa02   : > { %v4192_v6 = vmul.f32 %v4187_v50, %v5679_v29  ;;  %v4193_v51 = vmul.f32 %v4189_v54, %v5686_v34  ;;  %4461 = vmatmul.mubr.msk.f32.vlgmr.msra.gmra.mrb[8].mxu0 %vm1649_vm7, %v4102_v49 }
 0xa03   : > { %4261 = vmatprep.mubr.f32.mxu0 %v5229_v0 }
 0xa04   : > { %v4944_v1 = vpack.c.bf16 %v4192_v6, %v4190_v40  ;;  %v4942_v55 = vpack.c.bf16 %v4193_v51, %v4191_v62 }
 0xa06   : > { %4943 = vmatprep.subr.bf16.mxu0 %v4942_v55 }
 0xa07   : > { %4945 = vmatpush1.bf16.msra.mxu0 %v4944_v1 }
 0xa0a   : > { %4462 = vmatmul.mubr.msk.f32.vlgmr.msra.gmra.mrb[8].mxu0 %vm1649_vm7, %v4194_v57 }
 0xa11   : > { %v4273_v9 = vpop.permute.xlu1 %4272 }
 0xadd   : > { %v4263_v47 = vpop.f32.mrb[8].mxu0 }
 0xade   : > { %v4275_v31 = vadd.f32 %v4273_v9, %v4263_v47  ;;  %v4265_v29 = vpop.f32.mrb[9].mxu0 }
 0xadf   : > { %v4276_v32 = vadd.f32 %v4273_v9, %v4265_v29 }
 0xae0   : > { %v4277_v34 = vmul.f32 0.5, %v4275_v31 }
 0xae1   : > { %v4278_v58 = vmul.f32 0.5, %v4276_v32 }
 0xae2   : > { %5118 = vtanh.f32 %v4277_v34 }
 0xae3   : > { %5120 = vtanh.f32 %v4278_v58 }
 0xaec   : > { %v5119_v0 = vpop.eup %5118 }
 0xaed   : > { %v5121_v59 = vpop.eup %5120  ;;  %v4281_v3 = vadd.f32 1.0, %v5119_v0 }
 0xaee   : > { %v4282_v35 = vadd.f32 1.0, %v5121_v59 }
 0xaef   : > { %v4283_v11 = vmul.f32 0.5, %v4281_v3 }
 0xaf0   : > { %v4284_v36 = vmul.f32 0.5, %v4282_v35 }
 0xaf2   : > { %v4287_v38 = vcombine.low %v4283_v11, %v4284_v36 }
 0xaf4   : > { %4289 = vst [vmem:[%s484_s18] sm:$0x77] %v4287_v38 }
 0xaf5 PF: > { %s6340_s20 = sld [smem:[#allocation9_spill]] }
 0xafb   : > { %s25_s25 = sadd.s32 1, %s6340_s20  }
 0xafc   : > { %p22_p2 = scmp.ge.s32.totalorder %s25_s25, 4  }
 0xafe   :  { %24 = sbr.rel (!%p22_p2) target bundleno = 4 (0x4), region = 115 }
 0xb05   :  { %4311 = vsyncpa [#allocation3], 1 }
 0xb06   :  { %4313 = vsyncpa [#allocation3 + $0x1], 1 }
 0xb07   :  { %4314 = vsyncpa [#allocation5], 1 }

</bundles_post_ra>
